<compile_context>
chip_gen: v5e
topology: v5e:2x2
jax: 0.10.0
libtpu: 0.0.40
codegen_flags: <defaults>
</compile_context>

<pallas_src>
import functools

import numpy as np
import jax
import jax.numpy as jnp
from jax.experimental import pallas as pl
from jax.experimental.pallas import tpu as pltpu

# Row layout of the raw (18, C) per-channel parameter table (matches the
# PyTorch module): [hori_low, hori_high, vert_low, vert_high, gamma, beta]
# for the global branch, then local-7, then local-11.
HL, HH, VL, VH, GAMMA, BETA = 0, 1, 2, 3, 4, 5
G0, L7, L11 = 0, 6, 12


# --------------------------------------------------------------------------
# host-side constants
# --------------------------------------------------------------------------
@functools.lru_cache(maxsize=None)
def _pool_matrix(L, kernel):
    """P[t, j] = weight of input position t for output j of a stride-1,
    window-`kernel`, reflection-padded average pool along an axis of length L."""
    pad = kernel // 2
    P = np.zeros((L, L), np.float32)
    for j in range(L):
        for d in range(-pad, pad + 1):
            t = j + d
            if t < 0:
                t = -t
            elif t >= L:
                t = 2 * L - 2 - t
            P[t, j] += 1.0 / kernel
    return P


@functools.lru_cache(maxsize=None)
def _pool_constants_np(H, W):
    # Horizontal (along-W) pools for k=7 and k=11 fused into one (W, 2W)
    # matrix so both become a single matmul; vertical pool matrices transposed.
    pw_cat = np.concatenate([_pool_matrix(W, 7), _pool_matrix(W, 11)], axis=1)
    ph7t = np.ascontiguousarray(_pool_matrix(H, 7).T)
    ph11t = np.ascontiguousarray(_pool_matrix(H, 11).T)
    return pw_cat, ph7t, ph11t


def _padded_bytes(shape, itemsize):
    """Rough VMEM footprint of one block, padded to the (8, 128) tiling."""
    shape = tuple(int(s) for s in shape)
    if len(shape) == 1:
        shape = (1,) + shape
    lead = 1
    for s in shape[:-2]:
        lead *= s
    sub = -(-shape[-2] // 8) * 8
    lane = -(-shape[-1] // 128) * 128
    return lead * sub * lane * itemsize


def _divisors(n):
    return [d for d in range(1, n + 1) if n % d == 0]


def _estimate_vmem_bytes(CB, COT, H, W, cbytes):
    """Double-buffered inputs + resident output + in-kernel temporaries."""
    est = 0
    est += 2 * _padded_bytes((CB, 1, 13), 4)            # folded coefficients
    est += 2 * _padded_bytes((1, CB, H, W), cbytes)     # x block
    est += 2 * _padded_bytes((W, 2 * W), cbytes)        # [PW7 | PW11]
    est += 4 * _padded_bytes((H, H), cbytes)            # PH7^T, PH11^T
    est += 2 * _padded_bytes((1, COT, CB), cbytes)      # conv weight block
    est += 2 * _padded_bytes((COT, 1), 4)               # bias
    est += 2 * _padded_bytes((1, COT, H * W), 4)        # resident conv output
    # kernel temporaries (ho/vl/out f32, pool-matrix broadcasts, contrib)
    est += 10 * _padded_bytes((CB, H, W), 4)
    est += 2 * _padded_bytes((CB, H, H), cbytes)
    est += 2 * _padded_bytes((COT, H * W), 4)
    return est


def _pick_cout_tile(C, cb_guess, H, W, cbytes, budget):
    """Largest output-channel tile (divisor of C, multiple of 8 or C itself)
    whose working set fits the VMEM budget.  Only tiles on huge shapes."""
    cands = sorted({d for d in _divisors(C) if d == C or d % 8 == 0},
                   reverse=True)
    for cot in cands:
        if _estimate_vmem_bytes(cb_guess, cot, H, W, cbytes) <= budget:
            return cot
    return cands[-1]


def _pick_channel_block(C, COT, H, W, cbytes, budget, cap):
    """Largest channel (reduction) block that divides C, respects `cap`, and
    fits the VMEM budget.  Prefer multiples of 8 for sublane alignment."""
    divs = [d for d in _divisors(C) if d <= max(int(cap), 1)]
    pref = [d for d in divs if d % 8 == 0 or d == C] or divs
    for cb in sorted(pref, reverse=True):
        if _estimate_vmem_bytes(cb, COT, H, W, cbytes) <= budget:
            return cb
    return min(pref)


# --------------------------------------------------------------------------
# kernel
# --------------------------------------------------------------------------
def _fused_kernel(coef_ref, x_ref, pw_ref, ph7_ref, ph11_ref, w_ref, b_ref,
                  o_ref):
    """One grid step (n, o, c): strip attention (3 branches) for a CB-channel
    block of one batch element, then one MXU matmul accumulating its 1x1-conv
    contribution into the resident (C_out_tile, H*W) output block."""
    _, cb, H, W = x_ref.shape
    _, cot, hw = o_ref.shape
    blk = pl.program_id(2)              # channel-block (reduction) axis
    cdt = pw_ref.dtype                  # matmul operand dtype (bf16 or f32)

    x = x_ref[0]                        # (CB, H, W) in compute dtype
    xf = x.astype(jnp.float32)

    def p(i):                           # (CB, 1, 1) folded per-channel coeff
        return coef_ref[:, :, i:i + 1]

    # ---- strip attention: out = (sum betas) * x
    #        + sum_branches [ c * ho_b + d * pool_h_b(ho_b) ]
    #      ho_b = a * x + b * pool_w_b(x)
    out = p(0) * xf

    # global branch (pools are plain means; XLU reductions)
    hl_g = jnp.mean(xf, axis=2, keepdims=True)          # (CB, H, 1)
    ho_g = p(1) * xf + p(2) * hl_g
    vl_g = jnp.mean(ho_g, axis=1, keepdims=True)        # (CB, 1, W)
    out = out + p(3) * ho_g + p(4) * vl_g

    # local branches: both horizontal pools in ONE 2-D MXU matmul, with the
    # channel block folded into the M dimension (no pool-matrix broadcast).
    x2d = x.reshape(cb * H, W)
    hl_both = jnp.dot(x2d, pw_ref[...],
                      preferred_element_type=jnp.float32)
    hl_both = hl_both.reshape(cb, H, 2 * W)
    hl7 = hl_both[:, :, :W]
    hl11 = hl_both[:, :, W:]

    ho7 = p(5) * xf + p(6) * hl7
    ho11 = p(9) * xf + p(10) * hl11

    # vertical (along-H) pools: batched MXU matmuls with the (H, H) pool
    # matrix broadcast over the channel block.
    ph7 = jnp.broadcast_to(ph7_ref[...], (cb, H, H))
    vl7 = jnp.einsum('cjt,ctw->cjw', ph7, ho7.astype(cdt),
                     preferred_element_type=jnp.float32)
    ph11 = jnp.broadcast_to(ph11_ref[...], (cb, H, H))
    vl11 = jnp.einsum('cjt,ctw->cjw', ph11, ho11.astype(cdt),
                      preferred_element_type=jnp.float32)

    out = out + p(7) * ho7 + p(8) * vl7 + p(11) * ho11 + p(12) * vl11

    # ---- fused 1x1 conv on the MXU:
    #      contrib[o, hw] = sum_c W[o, c] * out[c, hw]
    out2d = out.astype(cdt).reshape(cb, H * W)
    w_blk = w_ref[0]                                    # (C_out_tile, CB)
    contrib = jnp.dot(w_blk, out2d,
                      preferred_element_type=jnp.float32)   # (COT, H*W)

    @pl.when(blk == 0)
    def _():
        o_ref[0] = jnp.broadcast_to(b_ref[...], (cot, hw))

    o_ref[0] = o_ref[0] + contrib


# --------------------------------------------------------------------------
# wrapper
# --------------------------------------------------------------------------
def spec_atte(x, params, conv_w, conv_b, *, compute_dtype=jnp.bfloat16,
              max_channel_block=None):
    """x: (N, C, H, W); params: raw (18, C) per-channel parameter table;
    conv_w: (C, C) 1x1-conv weight (out, in); conv_b: (C,) bias.
    `compute_dtype` is the MXU operand dtype (accumulation is always f32)."""
    x = jnp.asarray(x)
    params = jnp.asarray(params, jnp.float32)
    conv_w = jnp.asarray(conv_w, jnp.float32)
    conv_b = jnp.asarray(conv_b, jnp.float32)
    N, C, H, W = x.shape
    cdt = jnp.dtype(compute_dtype)
    cbytes = cdt.itemsize

    # Fold the 18 raw per-channel params into 13 coefficient columns:
    #   ho = (hh+1)*x + (hl-hh-1)*pool_w(x)
    #   branch_out = beta*x + gamma*(vh+1)*ho + gamma*(vl-vh-1)*pool_h(ho)
    def branch(base):
        hl_, hh_, vl_, vh_, gam, bet = (params[base + i] for i in range(6))
        return [hh_ + 1.0, hl_ - hh_ - 1.0,
                gam * (vh_ + 1.0), gam * (vl_ - vh_ - 1.0)], bet

    g_c, g_b = branch(G0)
    l7_c, l7_b = branch(L7)
    l11_c, l11_b = branch(L11)
    coef = jnp.stack([g_b + l7_b + l11_b] + g_c + l7_c + l11_c, axis=1)
    coef = coef[:, None, :].astype(jnp.float32)          # (C, 1, 13)

    pw_np, ph7_np, ph11_np = _pool_constants_np(H, W)
    pw = jnp.asarray(pw_np, dtype=cdt)                   # (W, 2W)
    ph7t = jnp.asarray(ph7_np, dtype=cdt)                # (H, H)
    ph11t = jnp.asarray(ph11_np, dtype=cdt)              # (H, H)

    # Generation-aware VMEM budget (v5e/v6e 128 MiB, v7x 64 MiB physical).
    try:
        phys = int(getattr(pltpu.get_tpu_info(), "vmem_capacity_bytes", 0))
    except Exception:
        phys = 0
    if not phys:
        phys = 128 << 20
    budget = int(0.70 * phys)

    COT = _pick_cout_tile(C, min(C, 8), H, W, cbytes, budget)
    cap = max_channel_block if max_channel_block is not None else 128
    CB = _pick_channel_block(C, COT, H, W, cbytes, budget, cap)
    n_blk = C // CB
    n_cout = C // COT

    x_c = x.astype(cdt)
    # Pre-blocked conv weight: w_blocks[b, o, j] = conv_w[o, b*CB + j], so each
    # grid step loads a dense (C_out_tile, CB) slab.
    w_blocks = conv_w.reshape(C, n_blk, CB).transpose(1, 0, 2).astype(cdt)
    bias = conv_b.reshape(C, 1).astype(jnp.float32)

    est = _estimate_vmem_bytes(CB, COT, H, W, cbytes)
    vmem_limit = int(min(int(0.8 * phys),
                         max(32 << 20, est + (16 << 20))))

    grid = (N, n_cout, n_blk)
    y = pl.pallas_call(
        _fused_kernel,
        out_shape=jax.ShapeDtypeStruct((N, C, H * W), jnp.float32),
        grid=grid,
        in_specs=[
            pl.BlockSpec((CB, 1, 13), lambda n, o, c: (c, 0, 0)),      # coeffs
            pl.BlockSpec((1, CB, H, W), lambda n, o, c: (n, c, 0, 0)),  # x
            pl.BlockSpec((W, 2 * W), lambda n, o, c: (0, 0)),          # PW cat
            pl.BlockSpec((H, H), lambda n, o, c: (0, 0)),              # PH7^T
            pl.BlockSpec((H, H), lambda n, o, c: (0, 0)),              # PH11^T
            pl.BlockSpec((1, COT, CB), lambda n, o, c: (c, o, 0)),     # conv W
            pl.BlockSpec((COT, 1), lambda n, o, c: (o, 0)),            # bias
        ],
        out_specs=pl.BlockSpec((1, COT, H * W), lambda n, o, c: (n, o, 0)),
        compiler_params=pltpu.CompilerParams(
            dimension_semantics=("parallel", "parallel", "arbitrary"),
            vmem_limit_bytes=vmem_limit),
    )(coef, x_c, pw, ph7t, ph11t, w_blocks, bias)
    return y.reshape(N, C, H, W)


# ---------------- pure-JAX reference (for validation) ----------------
def _ref(x, params, conv_w, conv_b):
    N, C, H, W = x.shape

    def P(i):
        return params[i].reshape(1, C, 1, 1)

    def local_pool_w(z, k):
        pad = k // 2
        zp = jnp.pad(z, ((0, 0), (0, 0), (0, 0), (pad, pad)), mode="reflect")
        return sum(zp[..., i:i + W] for i in range(k)) / k

    def local_pool_h(z, k):
        pad = k // 2
        zp = jnp.pad(z, ((0, 0), (0, 0), (pad, pad), (0, 0)), mode="reflect")
        return sum(zp[:, :, i:i + H, :] for i in range(k)) / k

    def strip(z, base, hori_pool, vert_pool):
        hl = hori_pool(z)
        hh = z - hl
        ho = P(base + HL) * hl + (P(base + HH) + 1.0) * hh
        vl = vert_pool(ho)
        vh = ho - vl
        vo = P(base + VL) * vl + (P(base + VH) + 1.0) * vh
        return z * P(base + BETA) + vo * P(base + GAMMA)

    g = strip(x, G0,
              lambda z: jnp.mean(z, axis=3, keepdims=True),
              lambda z: jnp.mean(z, axis=2, keepdims=True))
    l7 = strip(x, L7, lambda z: local_pool_w(z, 7), lambda z: local_pool_h(z, 7))
    l11 = strip(x, L11, lambda z: local_pool_w(z, 11), lambda z: local_pool_h(z, 11))
    out = g + l7 + l11
    y = jnp.einsum("dc,nchw->ndhw", conv_w, out,
                   precision=jax.lax.Precision.HIGHEST)
    return y + conv_b[None, :, None, None]


def _run_case(key, N, C, H, W, compute_dtype, atol, rtol,
              max_channel_block=None):
    kx, kp, kw, kb = jax.random.split(key, 4)
    x = jax.random.normal(kx, (N, C, H, W), jnp.float32)
    params = 0.1 * jax.random.normal(kp, (18, C), jnp.float32)
    params = (params.at[G0 + BETA].add(1.0)
                    .at[L7 + BETA].add(1.0)
                    .at[L11 + BETA].add(1.0))
    conv_w = 0.2 * jax.random.normal(kw, (C, C), jnp.float32)
    conv_b = 0.1 * jax.random.normal(kb, (C,), jnp.float32)

    y = jax.block_until_ready(
        spec_atte(x, params, conv_w, conv_b, compute_dtype=compute_dtype,
                  max_channel_block=max_channel_block))
    y_ref = np.asarray(_ref(x, params, conv_w, conv_b))
    assert y.shape == (N, C, H, W)
    assert np.allclose(np.asarray(y), y_ref, atol=atol, rtol=rtol), \
        f"Pallas output mismatch vs JAX reference for shape {(N, C, H, W)}"


if __name__ == "__main__":
    key = jax.random.PRNGKey(0)
    k1, k2 = jax.random.split(key)
    # primary case (matches the module's small-shape test); bf16 MXU operands,
    # so the tolerance is sized for bf16 rounding in the pool / conv matmuls.
    _run_case(k1, N=2, C=4, H=16, W=16, compute_dtype=jnp.bfloat16,
              atol=8e-2, rtol=2e-2)
    # second case exercises the channel-block reduction path (C // CB == 2)
    # with f32 matmul operands and a tight tolerance.
    _run_case(k2, N=1, C=16, H=8, W=24, compute_dtype=jnp.float32,
              max_channel_block=8, atol=5e-3, rtol=5e-3)
    print("KERNEL_OK")
</pallas_src>

<mosaic_0001>
module attributes {stable_mosaic.version = 11 : i64} {
  func.func @_fused_kernel(%arg0: i32, %arg1: i32, %arg2: i32, %arg3: memref<4x1x13xf32, #tpu.memory_space<vmem>>, %arg4: memref<1x4x16x16xbf16, #tpu.memory_space<vmem>>, %arg5: memref<16x32xbf16, #tpu.memory_space<vmem>>, %arg6: memref<16x16xbf16, #tpu.memory_space<vmem>>, %arg7: memref<16x16xbf16, #tpu.memory_space<vmem>>, %arg8: memref<1x4x4xbf16, #tpu.memory_space<vmem>>, %arg9: memref<4x1xf32, #tpu.memory_space<vmem>>, %arg10: memref<1x4x256xf32, #tpu.memory_space<vmem>>) attributes {dimension_semantics = [#tpu.dimension_semantics<parallel>, #tpu.dimension_semantics<parallel>, #tpu.dimension_semantics<arbitrary>], iteration_bounds = array<i64: 2, 1, 1>, scalar_prefetch = 0 : i64, scratch_operands = 0 : i64, tpu.core_type = #tpu.core_type<tc>, window_params = [{transform_indices = @transform_0, window_bounds = array<i64: 4, 1, 13>}, {transform_indices = @transform_1, window_bounds = array<i64: 1, 4, 16, 16>}, {pipeline_mode = #tpu.pipeline_mode<synchronous>, transform_indices = @transform_2, window_bounds = array<i64: 16, 32>}, {pipeline_mode = #tpu.pipeline_mode<synchronous>, transform_indices = @transform_3, window_bounds = array<i64: 16, 16>}, {pipeline_mode = #tpu.pipeline_mode<synchronous>, transform_indices = @transform_4, window_bounds = array<i64: 16, 16>}, {transform_indices = @transform_5, window_bounds = array<i64: 1, 4, 4>}, {transform_indices = @transform_6, window_bounds = array<i64: 4, 1>}, {transform_indices = @transform_7, window_bounds = array<i64: 1, 4, 256>}]} {
    %c0 = arith.constant 0 : index
    %c0_0 = arith.constant 0 : index
    %c0_1 = arith.constant 0 : index
    %c0_2 = arith.constant 0 : index
    %0 = vector.load %arg4[%c0, %c0_0, %c0_1, %c0_2] : memref<1x4x16x16xbf16, #tpu.memory_space<vmem>>, vector<1x4x16x16xbf16>
    %1 = vector.shape_cast %0 : vector<1x4x16x16xbf16> to vector<4x16x16xbf16>
    %2 = arith.extf %1 : vector<4x16x16xbf16> to vector<4x16x16xf32>
    %c0_3 = arith.constant 0 : index
    %c0_4 = arith.constant 0 : index
    %c0_5 = arith.constant 0 : index
    %3 = vector.load %arg3[%c0_3, %c0_4, %c0_5] : memref<4x1x13xf32, #tpu.memory_space<vmem>>, vector<4x1x1xf32>
    %4 = vector.broadcast %3 : vector<4x1x1xf32> to vector<4x16x16xf32>
    %5 = arith.mulf %4, %2 : vector<4x16x16xf32>
    %cst = arith.constant dense<0.000000e+00> : vector<4x16xf32>
    %6 = vector.multi_reduction <add>, %2, %cst [2] : vector<4x16x16xf32> to vector<4x16xf32>
    %7 = vector.shape_cast %6 : vector<4x16xf32> to vector<4x16x1xf32>
    %cst_6 = arith.constant 1.600000e+01 : f32
    %8 = vector.broadcast %cst_6 : f32 to vector<4x16x1xf32>
    %9 = arith.divf %7, %8 : vector<4x16x1xf32>
    %c0_7 = arith.constant 0 : index
    %c0_8 = arith.constant 0 : index
    %c1 = arith.constant 1 : index
    %10 = vector.load %arg3[%c0_7, %c0_8, %c1] : memref<4x1x13xf32, #tpu.memory_space<vmem>>, vector<4x1x1xf32>
    %11 = vector.broadcast %10 : vector<4x1x1xf32> to vector<4x16x16xf32>
    %12 = arith.mulf %11, %2 : vector<4x16x16xf32>
    %c0_9 = arith.constant 0 : index
    %c0_10 = arith.constant 0 : index
    %c2 = arith.constant 2 : index
    %13 = vector.load %arg3[%c0_9, %c0_10, %c2] : memref<4x1x13xf32, #tpu.memory_space<vmem>>, vector<4x1x1xf32>
    %14 = vector.broadcast %13 : vector<4x1x1xf32> to vector<4x16x1xf32>
    %15 = arith.mulf %14, %9 : vector<4x16x1xf32>
    %16 = vector.broadcast %15 : vector<4x16x1xf32> to vector<4x16x16xf32>
    %17 = arith.addf %12, %16 : vector<4x16x16xf32>
    %cst_11 = arith.constant dense<0.000000e+00> : vector<4x16xf32>
    %18 = vector.multi_reduction <add>, %17, %cst_11 [1] : vector<4x16x16xf32> to vector<4x16xf32>
    %19 = vector.shape_cast %18 : vector<4x16xf32> to vector<4x1x16xf32>
    %cst_12 = arith.constant 1.600000e+01 : f32
    %20 = vector.broadcast %cst_12 : f32 to vector<4x1x16xf32>
    %21 = arith.divf %19, %20 : vector<4x1x16xf32>
    %c0_13 = arith.constant 0 : index
    %c0_14 = arith.constant 0 : index
    %c3 = arith.constant 3 : index
    %22 = vector.load %arg3[%c0_13, %c0_14, %c3] : memref<4x1x13xf32, #tpu.memory_space<vmem>>, vector<4x1x1xf32>
    %23 = vector.broadcast %22 : vector<4x1x1xf32> to vector<4x16x16xf32>
    %24 = arith.mulf %23, %17 : vector<4x16x16xf32>
    %25 = arith.addf %5, %24 : vector<4x16x16xf32>
    %c0_15 = arith.constant 0 : index
    %c0_16 = arith.constant 0 : index
    %c4 = arith.constant 4 : index
    %26 = vector.load %arg3[%c0_15, %c0_16, %c4] : memref<4x1x13xf32, #tpu.memory_space<vmem>>, vector<4x1x1xf32>
    %27 = vector.broadcast %26 : vector<4x1x1xf32> to vector<4x1x16xf32>
    %28 = arith.mulf %27, %21 : vector<4x1x16xf32>
    %29 = vector.broadcast %28 : vector<4x1x16xf32> to vector<4x16x16xf32>
    %30 = arith.addf %25, %29 : vector<4x16x16xf32>
    %31 = vector.shape_cast %1 : vector<4x16x16xbf16> to vector<64x16xbf16>
    %c0_17 = arith.constant 0 : index
    %c0_18 = arith.constant 0 : index
    %32 = vector.load %arg5[%c0_17, %c0_18] : memref<16x32xbf16, #tpu.memory_space<vmem>>, vector<16x32xbf16>
    %cst_19 = arith.constant dense<0.000000e+00> : vector<64x32xf32>
    %33 = tpu.matmul %31, %32, %cst_19 {dimension_numbers = #tpu.dot_dimension_numbers<[1], [0], [0], [1], [0, 0, 1, 1], [], []>} : vector<64x16xbf16>, vector<16x32xbf16>, vector<64x32xf32> -> vector<64x32xf32>
    %34 = vector.shape_cast %33 : vector<64x32xf32> to vector<4x16x32xf32>
    %35 = vector.extract_strided_slice %34 {offsets = [0, 0, 0], sizes = [4, 16, 16], strides = [1, 1, 1]} : vector<4x16x32xf32> to vector<4x16x16xf32>
    %36 = vector.extract_strided_slice %34 {offsets = [0, 0, 16], sizes = [4, 16, 16], strides = [1, 1, 1]} : vector<4x16x32xf32> to vector<4x16x16xf32>
    %c0_20 = arith.constant 0 : index
    %c0_21 = arith.constant 0 : index
    %c5 = arith.constant 5 : index
    %37 = vector.load %arg3[%c0_20, %c0_21, %c5] : memref<4x1x13xf32, #tpu.memory_space<vmem>>, vector<4x1x1xf32>
    %38 = vector.broadcast %37 : vector<4x1x1xf32> to vector<4x16x16xf32>
    %39 = arith.mulf %38, %2 : vector<4x16x16xf32>
    %c0_22 = arith.constant 0 : index
    %c0_23 = arith.constant 0 : index
    %c6 = arith.constant 6 : index
    %40 = vector.load %arg3[%c0_22, %c0_23, %c6] : memref<4x1x13xf32, #tpu.memory_space<vmem>>, vector<4x1x1xf32>
    %41 = vector.broadcast %40 : vector<4x1x1xf32> to vector<4x16x16xf32>
    %42 = arith.mulf %41, %35 : vector<4x16x16xf32>
    %43 = arith.addf %39, %42 : vector<4x16x16xf32>
    %c0_24 = arith.constant 0 : index
    %c0_25 = arith.constant 0 : index
    %c9 = arith.constant 9 : index
    %44 = vector.load %arg3[%c0_24, %c0_25, %c9] : memref<4x1x13xf32, #tpu.memory_space<vmem>>, vector<4x1x1xf32>
    %45 = vector.broadcast %44 : vector<4x1x1xf32> to vector<4x16x16xf32>
    %46 = arith.mulf %45, %2 : vector<4x16x16xf32>
    %c0_26 = arith.constant 0 : index
    %c0_27 = arith.constant 0 : index
    %c10 = arith.constant 10 : index
    %47 = vector.load %arg3[%c0_26, %c0_27, %c10] : memref<4x1x13xf32, #tpu.memory_space<vmem>>, vector<4x1x1xf32>
    %48 = vector.broadcast %47 : vector<4x1x1xf32> to vector<4x16x16xf32>
    %49 = arith.mulf %48, %36 : vector<4x16x16xf32>
    %50 = arith.addf %46, %49 : vector<4x16x16xf32>
    %c0_28 = arith.constant 0 : index
    %c0_29 = arith.constant 0 : index
    %51 = vector.load %arg6[%c0_28, %c0_29] : memref<16x16xbf16, #tpu.memory_space<vmem>>, vector<16x16xbf16>
    %52 = vector.shape_cast %51 : vector<16x16xbf16> to vector<1x16x16xbf16>
    %53 = vector.broadcast %52 : vector<1x16x16xbf16> to vector<4x16x16xbf16>
    %54 = arith.truncf %43 : vector<4x16x16xf32> to vector<4x16x16xbf16>
    "tpu.trace_start"() <{level = 10 : i32, message = "cjt,ctw->cjw"}> : () -> ()
    %cst_30 = arith.constant dense<0.000000e+00> : vector<4x16x16xf32>
    %55 = tpu.matmul %53, %54, %cst_30 {dimension_numbers = #tpu.dot_dimension_numbers<[2], [1], [1], [2], [0, 0, 0, 1, 1, 2], [0], [0]>} : vector<4x16x16xbf16>, vector<4x16x16xbf16>, vector<4x16x16xf32> -> vector<4x16x16xf32>
    "tpu.trace_stop"() : () -> ()
    %c0_31 = arith.constant 0 : index
    %c0_32 = arith.constant 0 : index
    %56 = vector.load %arg7[%c0_31, %c0_32] : memref<16x16xbf16, #tpu.memory_space<vmem>>, vector<16x16xbf16>
    %57 = vector.shape_cast %56 : vector<16x16xbf16> to vector<1x16x16xbf16>
    %58 = vector.broadcast %57 : vector<1x16x16xbf16> to vector<4x16x16xbf16>
    %59 = arith.truncf %50 : vector<4x16x16xf32> to vector<4x16x16xbf16>
    "tpu.trace_start"() <{level = 10 : i32, message = "cjt,ctw->cjw"}> : () -> ()
    %cst_33 = arith.constant dense<0.000000e+00> : vector<4x16x16xf32>
    %60 = tpu.matmul %58, %59, %cst_33 {dimension_numbers = #tpu.dot_dimension_numbers<[2], [1], [1], [2], [0, 0, 0, 1, 1, 2], [0], [0]>} : vector<4x16x16xbf16>, vector<4x16x16xbf16>, vector<4x16x16xf32> -> vector<4x16x16xf32>
    "tpu.trace_stop"() : () -> ()
    %c0_34 = arith.constant 0 : index
    %c0_35 = arith.constant 0 : index
    %c7 = arith.constant 7 : index
    %61 = vector.load %arg3[%c0_34, %c0_35, %c7] : memref<4x1x13xf32, #tpu.memory_space<vmem>>, vector<4x1x1xf32>
    %62 = vector.broadcast %61 : vector<4x1x1xf32> to vector<4x16x16xf32>
    %63 = arith.mulf %62, %43 : vector<4x16x16xf32>
    %64 = arith.addf %30, %63 : vector<4x16x16xf32>
    %c0_36 = arith.constant 0 : index
    %c0_37 = arith.constant 0 : index
    %c8 = arith.constant 8 : index
    %65 = vector.load %arg3[%c0_36, %c0_37, %c8] : memref<4x1x13xf32, #tpu.memory_space<vmem>>, vector<4x1x1xf32>
    %66 = vector.broadcast %65 : vector<4x1x1xf32> to vector<4x16x16xf32>
    %67 = arith.mulf %66, %55 : vector<4x16x16xf32>
    %68 = arith.addf %64, %67 : vector<4x16x16xf32>
    %c0_38 = arith.constant 0 : index
    %c0_39 = arith.constant 0 : index
    %c11 = arith.constant 11 : index
    %69 = vector.load %arg3[%c0_38, %c0_39, %c11] : memref<4x1x13xf32, #tpu.memory_space<vmem>>, vector<4x1x1xf32>
    %70 = vector.broadcast %69 : vector<4x1x1xf32> to vector<4x16x16xf32>
    %71 = arith.mulf %70, %50 : vector<4x16x16xf32>
    %72 = arith.addf %68, %71 : vector<4x16x16xf32>
    %c0_40 = arith.constant 0 : index
    %c0_41 = arith.constant 0 : index
    %c12 = arith.constant 12 : index
    %73 = vector.load %arg3[%c0_40, %c0_41, %c12] : memref<4x1x13xf32, #tpu.memory_space<vmem>>, vector<4x1x1xf32>
    %74 = vector.broadcast %73 : vector<4x1x1xf32> to vector<4x16x16xf32>
    %75 = arith.mulf %74, %60 : vector<4x16x16xf32>
    %76 = arith.addf %72, %75 : vector<4x16x16xf32>
    %77 = arith.truncf %76 : vector<4x16x16xf32> to vector<4x16x16xbf16>
    %78 = vector.shape_cast %77 : vector<4x16x16xbf16> to vector<4x256xbf16>
    %c0_42 = arith.constant 0 : index
    %c0_43 = arith.constant 0 : index
    %c0_44 = arith.constant 0 : index
    %79 = vector.load %arg8[%c0_42, %c0_43, %c0_44] : memref<1x4x4xbf16, #tpu.memory_space<vmem>>, vector<1x4x4xbf16>
    %80 = vector.shape_cast %79 : vector<1x4x4xbf16> to vector<4x4xbf16>
    %cst_45 = arith.constant dense<0.000000e+00> : vector<4x256xf32>
    %81 = tpu.matmul %80, %78, %cst_45 {dimension_numbers = #tpu.dot_dimension_numbers<[1], [0], [0], [1], [0, 0, 1, 1], [], []>} : vector<4x4xbf16>, vector<4x256xbf16>, vector<4x256xf32> -> vector<4x256xf32>
    %c0_i32 = arith.constant 0 : i32
    %82 = arith.cmpi eq, %arg2, %c0_i32 : i32
    %83 = arith.extui %82 : i1 to i32
    %c0_i32_46 = arith.constant 0 : i32
    %84 = arith.cmpi ne, %83, %c0_i32_46 : i32
    scf.if %84 {
      %c0_53 = arith.constant 0 : index
      %c0_54 = arith.constant 0 : index
      %91 = vector.load %arg9[%c0_53, %c0_54] : memref<4x1xf32, #tpu.memory_space<vmem>>, vector<4x1xf32>
      %92 = vector.shape_cast %91 : vector<4x1xf32> to vector<4x1xf32>
      %93 = vector.broadcast %92 : vector<4x1xf32> to vector<4x256xf32>
      %c0_55 = arith.constant 0 : index
      %c0_56 = arith.constant 0 : index
      %c0_57 = arith.constant 0 : index
      %94 = vector.load %arg10[%c0_55, %c0_56, %c0_57] : memref<1x4x256xf32, #tpu.memory_space<vmem>>, vector<1x4x256xf32>
      %95 = vector.shape_cast %94 : vector<1x4x256xf32> to vector<4x256xf32>
      %96 = vector.shape_cast %93 : vector<4x256xf32> to vector<1x4x256xf32>
      tpu.vector_store %arg10[%c0_55, %c0_56, %c0_57], %96 {strides = array<i32>} : memref<1x4x256xf32, #tpu.memory_space<vmem>>, vector<1x4x256xf32>,
    } else {
    }
    %c0_47 = arith.constant 0 : index
    %c0_48 = arith.constant 0 : index
    %c0_49 = arith.constant 0 : index
    %85 = vector.load %arg10[%c0_47, %c0_48, %c0_49] : memref<1x4x256xf32, #tpu.memory_space<vmem>>, vector<1x4x256xf32>
    %86 = vector.shape_cast %85 : vector<1x4x256xf32> to vector<4x256xf32>
    %87 = arith.addf %86, %81 : vector<4x256xf32>
    %c0_50 = arith.constant 0 : index
    %c0_51 = arith.constant 0 : index
    %c0_52 = arith.constant 0 : index
    %88 = vector.load %arg10[%c0_50, %c0_51, %c0_52] : memref<1x4x256xf32, #tpu.memory_space<vmem>>, vector<1x4x256xf32>
    %89 = vector.shape_cast %88 : vector<1x4x256xf32> to vector<4x256xf32>
    %90 = vector.shape_cast %87 : vector<4x256xf32> to vector<1x4x256xf32>
    tpu.vector_store %arg10[%c0_50, %c0_51, %c0_52], %90 {strides = array<i32>} : memref<1x4x256xf32, #tpu.memory_space<vmem>>, vector<1x4x256xf32>,
    return
  }
  func.func @transform_0(%arg0: i32, %arg1: i32, %arg2: i32) -> (i32, i32, i32) {
    %c0_i32 = arith.constant 0 : i32
    %c0_i32_0 = arith.constant 0 : i32
    %c0_i32_1 = arith.constant 0 : i32
    return %arg2, %c0_i32, %c0_i32_0 : i32, i32, i32
  }
  func.func @transform_1(%arg0: i32, %arg1: i32, %arg2: i32) -> (i32, i32, i32, i32) {
    %c0_i32 = arith.constant 0 : i32
    %c0_i32_0 = arith.constant 0 : i32
    %c0_i32_1 = arith.constant 0 : i32
    return %arg0, %arg2, %c0_i32, %c0_i32_0 : i32, i32, i32, i32
  }
  func.func @transform_2(%arg0: i32, %arg1: i32, %arg2: i32) -> (i32, i32) {
    %c0_i32 = arith.constant 0 : i32
    %c0_i32_0 = arith.constant 0 : i32
    %c0_i32_1 = arith.constant 0 : i32
    return %c0_i32, %c0_i32_0 : i32, i32
  }
  func.func @transform_3(%arg0: i32, %arg1: i32, %arg2: i32) -> (i32, i32) {
    %c0_i32 = arith.constant 0 : i32
    %c0_i32_0 = arith.constant 0 : i32
    %c0_i32_1 = arith.constant 0 : i32
    return %c0_i32, %c0_i32_0 : i32, i32
  }
  func.func @transform_4(%arg0: i32, %arg1: i32, %arg2: i32) -> (i32, i32) {
    %c0_i32 = arith.constant 0 : i32
    %c0_i32_0 = arith.constant 0 : i32
    %c0_i32_1 = arith.constant 0 : i32
    return %c0_i32, %c0_i32_0 : i32, i32
  }
  func.func @transform_5(%arg0: i32, %arg1: i32, %arg2: i32) -> (i32, i32, i32) {
    %c0_i32 = arith.constant 0 : i32
    %c0_i32_0 = arith.constant 0 : i32
    return %arg2, %arg1, %c0_i32 : i32, i32, i32
  }
  func.func @transform_6(%arg0: i32, %arg1: i32, %arg2: i32) -> (i32, i32) {
    %c0_i32 = arith.constant 0 : i32
    %c0_i32_0 = arith.constant 0 : i32
    return %arg1, %c0_i32 : i32, i32
  }
  func.func @transform_7(%arg0: i32, %arg1: i32, %arg2: i32) -> (i32, i32, i32) {
    %c0_i32 = arith.constant 0 : i32
    %c0_i32_0 = arith.constant 0 : i32
    return %arg0, %arg1, %c0_i32 : i32, i32, i32
  }
}

</mosaic_0001>

<bundles_post_ra>
// kernel: tpu_custom_call.1
= control target key start
LH: loop header
LB: loop body
LE: loop exit
PB: predicated region body
PF: predicated region fallthrough
CT: control target
= control target key end

     0   :  { %s2901_s0 = inlined_call_operand.vmem [shape: f32[4,1,13], index: 0, kind: input, shape index: {}]   ;;  %s2902_s1 = inlined_call_operand.hbm [shape: bf16[2,4,16,16], index: 1, kind: input, shape index: {}]   ;;  %s2903_s2 = inlined_call_operand.hbm [shape: bf16[16,32], index: 2, kind: input, shape index: {}]   ;;  %s2904_s3 = inlined_call_operand.hbm [shape: bf16[16,16], index: 3, kind: input, shape index: {}]   ;;  %s2905_s4 = inlined_call_operand.hbm [shape: bf16[16,16], index: 4, kind: input, shape index: {}]   ;;  %s2906_s5 = inlined_call_operand.vmem [shape: bf16[1,4,4], index: 5, kind: input, shape index: {}]   ;;  %s2907_s6 = inlined_call_operand.vmem [shape: f32[4,1], index: 6, kind: input, shape index: {}]   ;;  %s2908_s7 = inlined_call_operand.hbm [shape: f32[2,4,256], index: 7, kind: output, shape index: {}]  }
   0x1   :  { %2914 = sst [smem:[#allocation17_spill]] %s2903_s2 }
   0x2   :  { %2915 = sst [smem:[#allocation18_spill]] %s2904_s3 }
   0x3   :  { %2916 = sst [smem:[#allocation19_spill]] %s2905_s4 }
   0x4   :  { %12 = vsyncpa [#allocation3], 0 }
   0x5   :  { %14 = vsyncpa [#allocation3 + $0x1], 0 }
   0x6   :  { %15 = vsyncpa [#allocation6], 0 }
   0x7   :  { %16 = vsyncpa [#allocation9], 0 }
   0x8   :  { %17 = vsyncpa [#allocation4], 0 }
   0x9   :  { %19 = vsyncpa [#allocation4 + $0x1], 0  ;;  %s2280_s24 = smov 0   ;;  %s2282_s25 = smov 0  }
   0xa   :  { %s2284_s26 = smov 0   ;;  %s2286_s27 = smov 0  }
   0xb   :  { %s2288_s28 = smov 0   ;;  %s2290_s29 = smov 0  }
   0xc LB: > { %2917 = sst [smem:[#allocation15_spill]] %s2209_s29  ;;  %s1753_s30 = sadd.s32 4294967295, %s2209_s29   ;;  %s2209_s29 = sphi %s2290_s29, %s25_s29   ;;  %s2205_s28 = sphi %s2288_s28, %s2938_s28   ;;  %s2201_s27 = sphi %s2286_s27, %s2937_s27   ;;  %s2197_s26 = sphi %s2284_s26, %s2936_s26   ;;  %s2193_s25 = sphi %s2282_s25, %s2935_s25   ;;  %s2189_s24 = sphi %s2280_s24, %s2934_s24  }
   0xd   : > { %s1754_s8 = sadd.s32 4294967294, %s2209_s29   ;;  %p92_p0 = scmp.ne.s32.totalorder %s2193_s25, %s2189_s24 }
   0xe   : > { %p2314_p1 = scmp.eq.s32.totalorder %s1753_s30, 0  ;;  %p2318_p2 = scmp.eq.s32.totalorder %s1753_s30, 1 }
   0xf   : > { %p241_p3 = scmp.eq.s32.totalorder %s1754_s8, 1  ;;  %p1755_p5 = scmp.ge.s32.totalorder %s2209_s29, 1 }
  0x10   : > { %p2324_p4 = por %p2314_p1, %p92_p0  ;;  %p248_p7 = scmp.lt.s32.totalorder %s2209_s29, 3 }
  0x11   : > { %p2329_p6 = por %p241_p3, %p92_p0  ;;  %s2922_s2 = sld [smem:[#allocation17_spill]] }
  0x12   : > { %p2337_p8 = pnand %p1755_p5, %p248_p7  ;;  %s2211_s17 = smov [#allocation5]  }
  0x13   : > { %s269_s18 = sshll.u32 %s2211_s17, 4  ;;  %p1762_p11 = scmp.ge.s32.totalorder %s2209_s29, 2  ;;  %s270_s18 = int_to_ptr.vmem [resolvable:$true] %s269_s18 }
  0x14   : > { %p1844_p9 = pneg %p2337_p8  ;;  %s2925_s3 = sld [smem:[#allocation18_spill]] }
  0x15   : > { %s2909_s23 = smov 64   ;;  %s2910_s30 = smov 4  }
  0x16   : > { %p2345_p10 = pnand %p1844_p9, %p2314_p1  ;;  %s2214_s8 = smov [#allocation7]  }
  0x17   : > { %s267_s15 = sshll.u32 %s2922_s2, 4  ;;  %s283_s13 = sshll.u32 %s2214_s8, 4  ;;  %s268_s15 = int_to_ptr.hbm [resolvable:$true] %s267_s15  ;;  %s284_s13 = int_to_ptr.vmem [resolvable:$true] %s283_s13 }
  0x18   : > { %1847 = dma.hbm_to_vmem [thread:$0]  (!%p2345_p10), %s268_s15, 128, %s270_s18, [#allocation6], %s2909_s23, %s2909_s23, %s2910_s30  }
  0x19   : > { %s2926_s4 = sld [smem:[#allocation19_spill]]  ;;  %s2215_s21 = smov [#allocation8]  }
  0x1a   : > { %s281_s22 = sshll.u32 %s2925_s3, 4  ;;  %s297_s2 = sshll.u32 %s2215_s21, 4  ;;  %s282_s22 = int_to_ptr.hbm [resolvable:$true] %s281_s22  ;;  %s298_s2 = int_to_ptr.vmem [resolvable:$true] %s297_s2 }
  0x1b   : > { %1850 = dma.hbm_to_vmem [thread:$0]  (!%p2345_p10), %s282_s22, 128, %s284_s13, [#allocation6], %s2909_s23, %s2909_s23, %s2910_s30  }
  0x1c   : > { %s44_s15 = sadd.s32 1, %s2205_s28  ;;  %s79_s18 = sadd.s32 1, %s2197_s26 }
  0x1d   : > { %p46_p12 = scmp.ge.s32.totalorder %s44_s15, 2  ;;  %p86_p13 = scmp.ne.s32.totalorder %s2197_s26, %s2193_s25 }
  0x1e   : > { %p87_p0 = scmp.eq.s32.totalorder %s2209_s29, 0  ;;  %p1865_p7 = scmp.lt.s32.totalorder %s2209_s29, 2 }
  0x1f   : > { %s295_s20 = sshll.u32 %s2926_s4, 4  ;;  %s2940_s15 = smov (%p46_p12, %s44_s15), 0  ;;  %s296_s20 = int_to_ptr.hbm [resolvable:$true] %s295_s20 }
  0x20   : > { %1853 = dma.hbm_to_vmem [thread:$0]  (!%p2345_p10), %s296_s20, 128, %s298_s2, [#allocation9], %s2909_s23, %s2909_s23, %s2910_s30  }
  0x21   : > { %2927 = sst [smem:[#allocation16_spill]] %s2940_s15  ;;  %p2378_p3 = por %p87_p0, %p86_p13 }
  0x22   : > { %p2384_p5 = por %p2318_p2, %p86_p13  ;;  %s74_s8 = ssub.s32 %s2205_s28, %s2940_s15 }
  0x23   : > { %p77_p9 = scmp.eq.s32.totalorder %s74_s8, 0  ;;  %s328_s2 = sand.u32 1, %s2197_s26  }
  0x24   : > { %s1763_s13 = sshll.u32 %s328_s2, 5  ;;  %s1819_s17 = sshll.u32 %s2205_s28, 5 }
  0x25   : > { %s2393_s14 = scalar_select %p77_p9, %s2197_s26, %s79_s18  }
  0x26   : > { %s340_s23 = scalar_lea.hbm %s2902_s1, %s1819_s17  ;;  %s332_s30 = scalar_lea.vmem [#allocation2], %s1763_s13 }
  0x27   : > { %s343_s3 = sshll.u32 %s332_s30, 4  ;;  %s341_s10 = sshll.u32 %s340_s23, 4  ;;  %s344_s3 = int_to_ptr.vmem [resolvable:$true] %s343_s3  ;;  %s342_s10 = int_to_ptr.hbm [resolvable:$true] %s341_s10 }
  0x28   : > { %p1855_p2 = pnand %p1865_p7, %p2378_p3  ;;  %s329_s4 = scalar_lea.sflag [#allocation3], %s328_s2 }
  0x29   : > { %s2930_s15 = smov 4   ;;  %s2931_s29 = smov 64  }
  0x2a   : > { %1857 = dma.hbm_to_vmem [thread:$0]  (!%p1855_p2), %s342_s10, 512, %s344_s3, %s329_s4, %s2931_s29, %s2931_s29, %s2930_s15  }
  0x2b   : > { %355 = sbr.rel (%p2337_p8) target bundleno = 889 (0x379), region = 48  ;;  %s2407_s18 = sand.u32 (!%p2337_p8), 1, %s2193_s25  }
  0x2c   : > { %s1767_s30 = sshll.u32 (!%p2337_p8), %s2407_s18, 5  ;;  %s358_s23 = scalar_lea.sflag (!%p2337_p8), [#allocation3], %s2407_s18 }
  0x2d   : > { %s2411_s8 = scalar_lea.vmem (!%p2337_p8), [#allocation2], %s1767_s30 }
  0x30   : > { %2172 = dma.done.wait (%p2324_p4), %s358_s23, 512  }
  0x31   : > { %2174 = vsyncadd (%p2324_p4), %s358_s23, 4294966784 }
  0x32   : > { %2176 = dma.done.wait (%p2314_p1), [#allocation6], 256  }
  0x33   : > { %2178 = vsyncadd (%p2314_p1), [#allocation6], 4294967040 }
  0x34   : > { %2180 = dma.done.wait (%p2314_p1), [#allocation9], 128  }
  0x35   : > { %2182 = vsyncadd (%p2314_p1), [#allocation9], 4294967168  ;;  %v2216_v0 = vmov 0   ;;  %v2217_v1 = vmov 10   ;;  %v1824_v2 = vld [vmem:[#allocation5] sm:$0xff]  ;;  %vm493_vm0 = vcmask 130048  }
  0x36   : > { %1948 = vset.pattern.permute.xlu1 %v2216_v0  ;;  %1947 = vset.pattern.permute.xlu0 %v2217_v1  ;;  %v2429_v3 = vld [vmem:[%s2901_s0 + $0x1] ss:$0 sm:$0xff]  ;;  %v2436_v5 = vld [vmem:[%s2901_s0] ss:$0 sm:$0xff]  ;;  %v2444_v6 = vld [vmem:[%s2901_s0 + $0x3] ss:$0 sm:$0xff] }
  0x37   : > { %1950 = vset.pattern.permute.xlu2 %v2217_v1  ;;  %v1820_v4 = vld [vmem:[%s2411_s8] sm:$0xff]  ;;  %768 = vmatpush.bf16.msra.mxu0 %v1824_v2  ;;  %v2218_v8 = vmov 5   ;;  %v1821_v9 = vld [vmem:[%s2411_s8 + $0x8] sm:$0xff]  ;;  %v2219_v10 = vmov 6   ;;  %v2220_v11 = vmov 9   ;;  %v1822_v12 = vld [vmem:[%s2411_s8 + $0x10] sm:$0xff] }
  0x38   : > { %474 = vperm.xlu1 %1948, %v2429_v3   ;;  %875 = vperm.xlu2 %1950, %v2429_v3   ;;  %v2449_v7 = vld [vmem:[%s2901_s0 + $0x2] ss:$0 sm:$0xff]  ;;  %v1823_v13 = vld [vmem:[%s2411_s8 + $0x18] sm:$0xff]  ;;  %v445_v19 = vld [vmem:[%s2411_s8 + $0x10] sm:$0xf]  ;;  %s2221_s2 = smov 112  }
  0x39   : > { %871 = vperm.xlu0 %1947, %v2436_v5   ;;  %v446_v14 = vld [vmem:[%s2411_s8 + $0x14] sm:$0xff]   ;;  %v2482_v20 = vunpack.c.l.bf16 %v445_v19  ;;  %v448_v22 = vld [vmem:[%s2411_s8 + $0x1c] sm:$0xf]  ;;  %v441_v26 = vld [vmem:[%s2411_s8] sm:$0xff]   ;;  %vm1313_vm2 = vcmask 1047556   ;;  %s2233_s13 = smov 64  }
  0x3a   : > { %1792 = vmatmul.msk.bf16.vlgmr.msra.gmra.mxu0 %vm493_vm0, %v1820_v4  ;;  %v2472_v15 = vunpack.c.l.bf16 %v446_v14  ;;  %v2477_v17 = vunpack.c.h.bf16 %v446_v14  ;;  %v2487_v23 = vunpack.c.l.bf16 %v448_v22  ;;  %v2494_v28 = vunpack.c.l.bf16 %v441_v26  ;;  %v443_v41 = vld [vmem:[%s2411_s8 + $0x8] sm:$0xff]   ;;  %s2234_s17 = smov 80   ;;  %s2235_s20 = smov 96  }
  0x3b   : > { %v506_v21 = vsel %vm493_vm0, %v2482_v20, 0.0  ;;  %v2501_v37 = vunpack.c.h.bf16 %v441_v26  ;;  %v2507_v47 = vunpack.c.l.bf16 %v443_v41  ;;  %v2517_v54 = vunpack.c.h.bf16 %v443_v41  ;;  %s2236_s21 = smov 16   ;;  %s2237_s10 = smov 32  }
  0x3c   : > { %v509_v16 = vsel %vm493_vm0, %v2472_v15, 0.0  ;;  %v512_v18 = vsel %vm493_vm0, %v2477_v17, 0.0  ;;  %v515_v24 = vsel %vm493_vm0, %v2487_v23, 0.0  ;;  %v494_v29 = vsel %vm493_vm0, %v2494_v28, 0.0  ;;  %s2238_s30 = smov 48   ;;  %s1771_s4 = sshll.u32 %s2407_s18, 3 }
  0x3d   : > { %vm1480_vm3 = vcmask 261120   ;;  %vm1483_vm4 = vcmask 392192   ;;  %vm1486_vm5 = vcmask 523264   ;;  %vm1489_vm6 = vcmask 654336   ;;  %s1827_s29 = sshll.u32 %s2201_s27, 3  ;;  %s422_s15 = scalar_lea.vmem [#allocation10], %s1771_s4 }
  0x3e   : > { %vm1492_vm7 = vcmask 785408   ;;  %vm1495_vm8 = vcmask 916480   ;;  %vm1518_vm9 = vcmask 1041408   ;;  %vm1514_vm10 = vcmask 31744   ;;  %s1587_s16 = scalar_lea.hbm %s2908_s7, %s1827_s29  ;;  %s1589_s22 = sshll.u32 %s422_s15, 4  ;;  %s1590_s22 = int_to_ptr.vmem [resolvable:$true] %s1589_s22 }
  0x3f   : > { %vm1568_vm11 = vcmask 1043456   ;;  %s1574_s27 = scalar_lea.sflag [#allocation4], %s2407_s18 }
  0x40   : > { %1949 = vset.pattern.permute.xlu1 %v2217_v1  ;;  %879 = vperm.xlu2 %1950, %v2449_v7  }
  0x41   : > { %883 = vperm.xlu1 %1949, %v2444_v6   ;;  %1953 = vset.pattern.permute.xlu0 %v2218_v8 }
  0x42   : > { %791 = vperm.xlu0 %1953, %v2436_v5  }
  0x48   : > { %1952 = vset.pattern.permute.xlu2 %v2219_v10 }
  0x49   : > { %1951 = vset.pattern.permute.xlu1 %v2218_v8  ;;  %819 = vperm.xlu2 %1952, %v2429_v3  }
  0x4a   : > { %795 = vperm.xlu1 %1951, %v2429_v3   ;;  %1793 = vmatmul.msk.bf16.gmra.mxu0 %vm493_vm0, %v1821_v9 }
  0x4b   : > { %1959 = vset.pattern.permute.xlu0 %v2219_v10 }
  0x4c   : > { %827 = vperm.xlu0 %1959, %v2444_v6  }
  0x51   : > { %1955 = vset.pattern.permute.xlu2 %v2220_v11 }
  0x52   : > { %1954 = vset.pattern.permute.xlu1 %v2219_v10  ;;  %847 = vperm.xlu2 %1955, %v2436_v5  }
  0x53   : > { %815 = vperm.xlu1 %1954, %v2436_v5  }
  0x54   : > { %1962 = vset.pattern.permute.xlu0 %v2216_v0 }
  0x5a   : > { %1794 = vmatmul.msk.bf16.gmra.mxu0 %vm493_vm0, %v1822_v12  ;;  %1957 = vset.pattern.permute.xlu2 %v2219_v10 }
  0x5b   : > { %1956 = vset.pattern.permute.xlu1 %v2218_v8  ;;  %823 = vperm.xlu2 %1957, %v2449_v7  }
  0x5c   : > { %799 = vperm.xlu1 %1956, %v2449_v7  }
  0x63   : > { %1958 = vset.pattern.permute.xlu2 %v2218_v8 }
  0x64   : > { %1960 = vset.pattern.permute.xlu1 %v2220_v11  ;;  %803 = vperm.xlu2 %1958, %v2444_v6  }
  0x65   : > { %859 = vperm.xlu1 %1960, %v2444_v6  }
  0x6a   : > { %1795 = vmatmul.msk.bf16.gmra.mxu0 %vm493_vm0, %v1823_v13 }
  0x6c   : > { %1961 = vset.pattern.permute.xlu2 %v2220_v11 }
  0x6d   : > { %851 = vperm.xlu2 %1961, %v2429_v3  }
  0x75   : > { %855 = vperm.xlu2 %1961, %v2449_v7  }
  0x76   : > { %510 = vadd.xlane.f32.xlu0 %v509_v16 }
  0x8f   : > { %513 = vadd.xlane.f32.xlu1 %v512_v18 }
  0x92   : > { %v876_v27 = vpop.permute.xlu2 %875 }
  0x9a   : > { %v880_v34 = vpop.permute.xlu2 %879 }
  0x9e   : > { %507 = vadd.xlane.f32.xlu2 %v506_v21 }
  0xa3   : > { %v820_v40 = vpop.permute.xlu2 %819 }
  0xa6   : > { %516 = vadd.xlane.f32.xlu2 %v515_v24 }
  0xaa   : > { %v2491_v25 = vpop.permute.xlu1 %474 }
  0xab   : > { %v872_v31 = vpop.permute.xlu0 %871 }
  0xac   : > { %v2521_v59 = vpop.permute.xlu2 %847 }
  0xae   : > { %495 = vadd.xlane.f32.xlu2 %v494_v29 }
  0xb3   : > { %v2498_v30 = vpop.permute.xlu1 %883 }
  0xb4   : > { %v792_v39 = vpop.permute.xlu0 %791 }
  0xb5   : > { %v806_v42 = vmul.f32 %v792_v39, %v2494_v28  ;;  %v807_v43 = vmul.f32 %v792_v39, %v2501_v37  ;;  %v824_v10 = vpop.permute.xlu2 %823 }
  0xb7   : > { %v770_v32 = vpop.f32.mrf.mxu0 }
  0xb8   : > { %v886_v33 = vmul.f32 %v872_v31, %v770_v32 }
  0xba   : > { %902 = vrot.lane.b32.xlu0 %v886_v33, %s2221_s2 }
  0xbc   : > { %v796_v35 = vpop.permute.xlu1 %795 }
  0xbd   : > { %v808_v55 = vmul.f32 %v796_v35, %v2507_v47  ;;  %v809_v61 = vmul.f32 %v796_v35, %v2517_v54 }
  0xbe   : > { %v804_v35 = vpop.permute.xlu2 %803 }
  0xbf   : > { %v772_v36 = vpop.f32.mrf.mxu0 }
  0xc0   : > { %v887_v38 = vmul.f32 %v872_v31, %v772_v36 }
  0xc2   : > { %904 = vrot.lane.b32.xlu1 %v887_v38, %s2221_s2 }
  0xc5   : > { %v816_v44 = vpop.permute.xlu1 %815 }
  0xc6   : > { %v830_v45 = vmul.f32 %v816_v44, %v770_v32  ;;  %v831_v46 = vmul.f32 %v816_v44, %v772_v36  ;;  %v828_v36 = vpop.permute.xlu0 %827 }
  0xc7   : > { %v775_v50 = vpop.f32.mrf.mxu0 }
  0xc8   : > { %v2509_v48 = vadd.f32 %v830_v45, %v806_v42  ;;  %v2511_v49 = vadd.f32 %v831_v46, %v807_v43  ;;  %v888_v51 = vmul.f32 %v876_v27, %v775_v50  ;;  %v832_v56 = vmul.f32 %v820_v40, %v775_v50 }
  0xc9   : > { %v813_v45 = vmul.f32 %v804_v35, %v2487_v23 }
  0xca   : > { %v936_v52 = vpack.c.bf16 %v2509_v48, %v2509_v48  ;;  %v937_v53 = vpack.c.bf16 %v2511_v49, %v2511_v49  ;;  %906 = vrot.lane.b32.xlu0 %v888_v51, %s2221_s2  ;;  %v2524_v62 = vadd.f32 %v832_v56, %v808_v55 }
  0xcc   : > { %v951_v57 = vunpack.c.l.b16 %v936_v52  ;;  %v952_v58 = vunpack.c.l.b16 %v937_v53  ;;  %v938_v8 = vpack.c.bf16 %v2524_v62, %v2524_v62 }
  0xce   : > { %v953_v60 = vpack.c.b16 %v952_v58, %v951_v57  ;;  %v974_v11 = vunpack.c.l.b16 %v938_v8  ;;  %v800_v13 = vpop.permute.xlu1 %799 }
  0xcf   : > { %v777_v63 = vpop.f32.mrf.mxu0  ;;  %v810_v19 = vmul.f32 %v800_v13, %v2482_v20  ;;  %v811_v22 = vmul.f32 %v800_v13, %v2472_v15  ;;  %v852_v13 = vpop.permute.xlu2 %851 }
  0xd0   : > { %965 = vmatpush.bf16.msra.mxu1 %v953_v60  ;;  %v833_v1 = vmul.f32 %v820_v40, %v777_v63  ;;  %v889_v2 = vmul.f32 %v876_v27, %v777_v63  ;;  %v2222_v60 = vmov 1  }
  0xd1   : > { %1963 = vset.pattern.permute.xlu1 %v2222_v60  ;;  %1964 = vset.pattern.permute.xlu2 %v2222_v60  ;;  %v865_v60 = vmul.f32 %v852_v13, %v2517_v54 }
  0xd2   : > { %v2526_v4 = vadd.f32 %v833_v1, %v809_v61  ;;  %908 = vrot.lane.b32.xlu1 %v889_v2, %s2221_s2  ;;  %v2223_v61 = vmov 16.0   ;;  %v500_v2 = vsel %vm493_vm0, %v2507_v47, 0.0 }
  0xd3   : > { %1997 = vrcp.f32 %v2223_v61 }
  0xd4   : > { %v939_v9 = vpack.c.bf16 %v2526_v4, %v2526_v4 }
  0xd6   : > { %v975_v12 = vunpack.c.l.b16 %v939_v9 }
  0xd7   : > { %v780_v14 = vpop.f32.mrf.mxu0  ;;  %v2563_v9 = vpop.permute.xlu1 %859 }
  0xd8   : > { %v890_v16 = vmul.f32 %v880_v34, %v780_v14  ;;  %v976_v18 = vpack.c.b16 %v975_v12, %v974_v11  ;;  %v834_v21 = vmul.f32 %v824_v10, %v780_v14 }
  0xd9   : > { %v1998_v63 = vpop.eup %1997 }
  0xda   : > { %985 = vmatpush.bf16.msra.mxu2 %v976_v18  ;;  %910 = vrot.lane.b32.xlu0 %v890_v16, %s2221_s2  ;;  %v2536_v24 = vadd.f32 %v834_v21, %v810_v19  ;;  %v519_v1 = vmul.f32 16.0, %v1998_v63  ;;  %vm523_vm1 = vweird.f32 %v1998_v63 }
  0xdc   : > { %v940_v32 = vpack.c.bf16 %v2536_v24, %v2536_v24  ;;  %v520_v8 = vsub.f32 1.0, %v519_v1 }
  0xde   : > { %v994_v38 = vunpack.c.l.b16 %v940_v32  ;;  %v521_v11 = vmul.f32 %v1998_v63, %v520_v8 }
  0xdf   : > { %v782_v26 = vpop.f32.mrf.mxu0 }
  0xe0   : > { %v835_v27 = vmul.f32 %v824_v10, %v782_v26  ;;  %v891_v29 = vmul.f32 %v880_v34, %v782_v26  ;;  %v812_v34 = vmul.f32 %v804_v35, %v2477_v17  ;;  %v503_v10 = vsel %vm493_vm0, %v2517_v54, 0.0 }
  0xe1   : > { %v522_v12 = vadd.f32 %v1998_v63, %v521_v11  ;;  %v2224_v26 = vmov 2   ;;  %v863_v35 = vmul.f32 %v2521_v59, %v2501_v37 }
  0xe2   : > { %v2538_v31 = vadd.f32 %v835_v27, %v811_v22  ;;  %912 = vrot.lane.b32.xlu1 %v891_v29, %s2221_s2  ;;  %v856_v22 = vpop.permute.xlu2 %855  ;;  %v862_v29 = vmul.f32 %v2521_v59, %v2494_v28 }
  0xe3   : > { %v2568_v14 = vsel %vm523_vm1, %v1998_v63, %v522_v12 }
  0xe4   : > { %v941_v33 = vpack.c.bf16 %v2538_v31, %v2538_v31 }
  0xe6   : > { %v995_v39 = vunpack.c.l.b16 %v941_v33 }
  0xe7   : > { %v785_v40 = vpop.f32.mrf.mxu0 }
  0xe8   : > { %v892_v41 = vmul.f32 %v2498_v30, %v785_v40  ;;  %v996_v42 = vpack.c.b16 %v995_v39, %v994_v38  ;;  %v836_v43 = vmul.f32 %v828_v36, %v785_v40 }
  0xe9   : > { %v511_v19 = vpop.xlane.xlu0 %510 }
  0xea   : > { %1005 = vmatpush.bf16.msra.mxu3 %v996_v42  ;;  %914 = vrot.lane.b32.xlu1 %v892_v41, %s2221_s2  ;;  %v2548_v44 = vadd.f32 %v836_v43, %v812_v34 }
  0xec   : > { %v942_v52 = vpack.c.bf16 %v2548_v44, %v2548_v44 }
  0xee   : > { %v1014_v56 = vunpack.c.l.b16 %v942_v52 }
  0xef   : > { %v787_v46 = vpop.f32.mrf.mxu0 }
  0xf0   : > { %v893_v50 = vmul.f32 %v2498_v30, %v787_v46  ;;  %v837_v51 = vmul.f32 %v828_v36, %v787_v46  ;;  %v497_v30 = vsel %vm493_vm0, %v2501_v37, 0.0  ;;  %v1825_v46 = vld [vmem:[#allocation7] sm:$0xff] }
  0xf1   : > { %1800 = vmatmul.msk.bf16.vlgmr.msra.gmra.mxu1 %vm493_vm0, %v1825_v46  ;;  %1801 = vmatmul.msk.bf16.vlgmr.msra.gmra.mxu2 %vm493_vm0, %v1825_v46 }
  0xf2   : > { %v2554_v53 = vadd.f32 %v837_v51, %v813_v45  ;;  %916 = vrot.lane.b32.xlu2 %v893_v50, %s2221_s2  ;;  %v530_v50 = vmul.f32 %v2568_v14, %v511_v19  ;;  %1802 = vmatmul.msk.bf16.vlgmr.msra.gmra.mxu3 %vm493_vm0, %v1825_v46 }
  0xf4   : > { %v943_v55 = vpack.c.bf16 %v2554_v53, %v2554_v53 }
  0xf6   : > { %v1015_v57 = vunpack.c.l.b16 %v943_v55  ;;  %v864_v55 = vmul.f32 %v852_v13, %v2507_v47 }
  0xf8   : > { %v1016_v58 = vpack.c.b16 %v1015_v57, %v1014_v56  ;;  %v566_v57 = vmul.f32 %v2449_v7, %v530_v50 }
  0xfa   : > { %1025 = vmatpush.bf16.msrb.mxu1 %v1016_v58 }
 0x101   : > { %1803 = vmatmul.msk.bf16.vlgmr.msrb.gmra.mxu1 %vm493_vm0, %v1825_v46 }
 0x102   : > { %v514_v16 = vpop.xlane.xlu1 %513 }
 0x103   : > { %v531_v18 = vmul.f32 %v2568_v14, %v514_v16 }
 0x104   : > { %498 = vadd.xlane.f32.xlu0 %v497_v30 }
 0x105   : > { %v567_v21 = vmul.f32 %v2444_v6, %v531_v18  ;;  %v866_v18 = vmul.f32 %v856_v22, %v2482_v20 }
 0x111   : > { %v508_v32 = vpop.xlane.xlu2 %507 }
 0x112   : > { %v529_v40 = vmul.f32 %v2568_v14, %v508_v32 }
 0x114   : > { %501 = vadd.xlane.f32.xlu1 %v500_v2  ;;  %v565_v59 = vmul.f32 %v2449_v7, %v529_v40 }
 0x118   : > { %470 = vperm.xlu0 %1962, %v2436_v5  }
 0x119   : > { %v517_v43 = vpop.xlane.xlu2 %516 }
 0x11a   : > { %v532_v51 = vmul.f32 %v2568_v14, %v517_v43 }
 0x11b   : > { %504 = vadd.xlane.f32.xlu2 %v503_v10 }
 0x11c   : > { %v568_v58 = vmul.f32 %v2444_v6, %v532_v51 }
 0x120   : > { %478 = vperm.xlu0 %1962, %v2449_v7  }
 0x121   : > { %v496_v30 = vpop.xlane.xlu2 %495 }
 0x122   : > { %v525_v63 = vmul.f32 %v2568_v14, %v496_v30 }
 0x124   : > { %v561_v10 = vmul.f32 %v2436_v5, %v525_v63  ;;  %v2225_v63 = vmov 4  }
 0x128   : > { %1967 = vset.pattern.permute.xlu0 %v2224_v26 }
 0x129   : > { %601 = vperm.xlu0 %1967, %v567_v21   ;;  %v867_v21 = vmul.f32 %v856_v22, %v2472_v15  ;;  %v868_v22 = vmul.f32 %v2563_v9, %v2477_v17 }
 0x12c   : > { %v903_v27 = vpop.permute.xlu0 %902 }
 0x12d   : > { %542 = vperm.xlu1 %1963, %v2449_v7   ;;  %v2576_v33 = vadd.f32 %v903_v27, %v862_v29 }
 0x12f   : > { %v1034_v38 = vpack.c.bf16 %v2576_v33, %v2576_v33 }
 0x131   : > { %v1049_v42 = vunpack.c.l.b16 %v1034_v38 }
 0x133   : > { %546 = vperm.xlu2 %1964, %v2444_v6  }
 0x134   : > { %v905_v36 = vpop.permute.xlu1 %904 }
 0x135   : > { %v2583_v39 = vadd.f32 %v905_v36, %v863_v35  ;;  %534 = vperm.xlu1 %1963, %v2436_v5   ;;  %v869_v35 = vmul.f32 %v2563_v9, %v2487_v23 }
 0x137   : > { %v1035_v41 = vpack.c.bf16 %v2583_v39, %v2583_v39 }
 0x139   : > { %v1050_v34 = vunpack.c.l.b16 %v1035_v41 }
 0x13b   : > { %538 = vperm.xlu2 %1964, %v2429_v3   ;;  %v1051_v45 = vpack.c.b16 %v1050_v34, %v1049_v42 }
 0x13c   : > { %v907_v52 = vpop.permute.xlu0 %906 }
 0x13d   : > { %1965 = vset.pattern.permute.xlu1 %v2224_v26  ;;  %1063 = vmatpush.bf16.msrb.mxu2 %v1051_v45  ;;  %v2597_v56 = vadd.f32 %v907_v52, %v864_v55 }
 0x13e   : > { %591 = vperm.xlu1 %1965, %v565_v59  }
 0x13f   : > { %v1036_v1 = vpack.c.bf16 %v2597_v56, %v2597_v56 }
 0x141   : > { %v1072_v11 = vunpack.c.l.b16 %v1036_v1 }
 0x143   : > { %1966 = vset.pattern.permute.xlu2 %v2224_v26 }
 0x144   : > { %v909_v61 = vpop.permute.xlu1 %908  ;;  %596 = vperm.xlu2 %1966, %v566_v57   ;;  %v1826_v57 = vld [vmem:[#allocation8] sm:$0xff] }
 0x145   : > { %v2605_v2 = vadd.f32 %v909_v61, %v865_v60  ;;  %1808 = vmatmul.msk.bf16.vlgmr.msrb.gmra.mxu2 %vm493_vm0, %v1826_v57  ;;  %v459_v61 = vld [vmem:[%s2901_s0 + $0x2] sm:$0x1] }
 0x146   : > { %606 = vperm.xlu1 %1965, %v568_v58  }
 0x147   : > { %v1037_v8 = vpack.c.bf16 %v2605_v2, %v2605_v2 }
 0x149   : > { %v1073_v12 = vunpack.c.l.b16 %v1037_v8 }
 0x14b   : > { %v1074_v13 = vpack.c.b16 %v1073_v12, %v1072_v11  ;;  %v2226_v11 = vmov 3  }
 0x14c   : > { %571 = vperm.xlu2 %1966, %v561_v10   ;;  %v911_v16 = vpop.permute.xlu0 %910  ;;  %v917_v32 = vpop.permute.xlu2 %916 }
 0x14d   : > { %1083 = vmatpush.bf16.msrb.mxu3 %v1074_v13  ;;  %v2612_v19 = vadd.f32 %v911_v16, %v866_v18  ;;  %v2623_v40 = vadd.f32 %v917_v32, %v869_v35  ;;  %v460_v13 = vld [vmem:[%s2901_s0 + $0x3] sm:$0x1]  ;;  %v458_v16 = vld [vmem:[%s2901_s0 + $0x1] sm:$0x1]  ;;  %v2227_v35 = vmov 7  }
 0x14f   : > { %v1038_v27 = vpack.c.bf16 %v2612_v19, %v2612_v19  ;;  %v1041_v43 = vpack.c.bf16 %v2623_v40, %v2623_v40 }
 0x150   : > { %1809 = vmatmul.msk.bf16.vlgmr.msrb.gmra.mxu3 %vm493_vm0, %v1826_v57 }
 0x151   : > { %v1092_v38 = vunpack.c.l.b16 %v1038_v27  ;;  %v1113_v46 = vunpack.c.l.b16 %v1041_v43 }
 0x154   : > { %v913_v26 = vpop.permute.xlu1 %912 }
 0x155   : > { %v2617_v29 = vadd.f32 %v913_v26, %v867_v21 }
 0x157   : > { %v1039_v36 = vpack.c.bf16 %v2617_v29, %v2617_v29 }
 0x159   : > { %v1093_v41 = vunpack.c.l.b16 %v1039_v36  ;;  %v1994_v36 = vld [vmem:[%s2901_s0 + $0x1] ss:$0 sm:$0xff] }
 0x15b   : > { %v1094_v42 = vpack.c.b16 %v1093_v41, %v1092_v38  ;;  %v1995_v38 = vld [vmem:[%s2901_s0 + $0x2] ss:$0 sm:$0xff] }
 0x15c   : > { %v915_v34 = vpop.permute.xlu1 %914 }
 0x15d   : > { %v2629_v59 = vadd.f32 %v915_v34, %v868_v22  ;;  %1103 = vmatpush.bf16.msra.mxu1 %v1094_v42  ;;  %v2228_v42 = vmov 8  }
 0x15f   : > { %v1040_v45 = vpack.c.bf16 %v2629_v59, %v2629_v59 }
 0x160   : > { %1810 = vmatmul.msk.bf16.vlgmr.msra.gmra.mxu1 %vm493_vm0, %v1826_v57 }
 0x161   : > { %v1112_v50 = vunpack.c.l.b16 %v1040_v45 }
 0x163   : > { %v1114_v51 = vpack.c.b16 %v1113_v46, %v1112_v50  ;;  %v1996_v46 = vld [vmem:[%s2901_s0] ss:$0 sm:$0xff]  ;;  %v2229_v50 = vmov 11  }
 0x165   : > { %1123 = vmatpush.bf16.msra.mxu2 %v1114_v51  ;;  %v2230_v51 = vmov 12  }
 0x168   : > { %1811 = vmatmul.msk.bf16.vlgmr.msra.gmra.mxu2 %vm493_vm0, %v1826_v57 }
 0x177   : > { %v499_v52 = vpop.xlane.xlu0 %498 }
 0x178   : > { %v526_v55 = vmul.f32 %v2568_v14, %v499_v52 }
 0x17a   : > { %v562_v9 = vmul.f32 %v2436_v5, %v526_v55 }
 0x17c   : > { %576 = vperm.xlu1 %1965, %v562_v9  }
 0x184   : > { %1968 = vset.pattern.permute.xlu1 %v2216_v0 }
 0x185   : > { %482 = vperm.xlu1 %1968, %v2444_v6  }
 0x187   : > { %v502_v58 = vpop.xlane.xlu1 %501 }
 0x188   : > { %v527_v60 = vmul.f32 %v2568_v14, %v502_v58 }
 0x18a   : > { %v563_v30 = vmul.f32 %v2429_v3, %v527_v60  ;;  %v2682_v52 = vpop.permute.xlu0 %470 }
 0x18c   : > { %581 = vperm.xlu2 %1966, %v563_v30  }
 0x18d   : > { %1971 = vset.pattern.permute.xlu1 %v2225_v63 }
 0x18e   : > { %700 = vperm.xlu1 %1971, %v459_v61   ;;  %v505_v1 = vpop.xlane.xlu2 %504 }
 0x18f   : > { %v528_v8 = vmul.f32 %v2568_v14, %v505_v1 }
 0x191   : > { %v564_v10 = vmul.f32 %v2429_v3, %v528_v8 }
 0x192   : > { %v479_v9 = vpop.permute.xlu0 %478 }
 0x193   : > { %586 = vperm.xlu0 %1967, %v564_v10  }
 0x194   : > { %1969 = vset.pattern.permute.xlu2 %v2226_v11 }
 0x195   : > { %666 = vperm.xlu2 %1969, %v2449_v7  }
 0x196   : > { %1973 = vset.pattern.permute.xlu1 %v2226_v11  ;;  %v2649_v12 = vpop.permute.xlu2 %546 }
 0x197   : > { %658 = vperm.xlu1 %1973, %v2436_v5   ;;  %v457_v5 = vld [vmem:[%s2901_s0] sm:$0x1]  ;;  %v556_v60 = vmul.f32 %v2649_v12, %v2487_v23 }
 0x19b   : > { %1970 = vset.pattern.permute.xlu0 %v2226_v11  ;;  %v602_v61 = vpop.permute.xlu0 %601 }
 0x19c   : > { %670 = vperm.xlu0 %1970, %v2444_v6   ;;  %v1993_v6 = vld [vmem:[%s2901_s0 + $0x3] ss:$0 sm:$0xff] }
 0x19d   : > { %1972 = vset.pattern.permute.xlu2 %v2225_v63 }
 0x19e   : > { %705 = vperm.xlu2 %1972, %v460_v13   ;;  %v2659_v18 = vpop.permute.xlu2 %538 }
 0x19f   : > { %1976 = vset.pattern.permute.xlu1 %v2225_v63  ;;  %v543_v7 = vpop.permute.xlu1 %542 }
 0x1a0   : > { %695 = vperm.xlu1 %1976, %v458_v16   ;;  %v554_v21 = vmul.f32 %v543_v7, %v2472_v15  ;;  %v553_v41 = vmul.f32 %v543_v7, %v2482_v20 }
 0x1a4   : > { %1975 = vset.pattern.permute.xlu0 %v2225_v63 }
 0x1a5   : > { %690 = vperm.xlu0 %1975, %v457_v5  }
 0x1a6   : > { %1974 = vset.pattern.permute.xlu2 %v2226_v11  ;;  %v597_v26 = vpop.permute.xlu2 %596 }
 0x1a7   : > { %v614_v27 = vadd.f32 %v597_v26, %v554_v21  ;;  %662 = vperm.xlu2 %1974, %v2429_v3   ;;  %v535_v32 = vpop.permute.xlu1 %534 }
 0x1a8   : > { %1978 = vset.pattern.permute.xlu1 %v2227_v35 }
 0x1a9   : > { %1155 = vperm.xlu1 %1978, %v1993_v6   ;;  %v636_v34 = vsel %vm493_vm0, %v614_v27, 0.0 }
 0x1ad   : > { %1979 = vset.pattern.permute.xlu0 %v2227_v35 }
 0x1ae   : > { %1147 = vperm.xlu0 %1979, %v1994_v36   ;;  %v572_v55 = vpop.permute.xlu2 %571 }
 0x1af   : > { %1977 = vset.pattern.permute.xlu2 %v2227_v35 }
 0x1b0   : > { %v592_v22 = vpop.permute.xlu1 %591  ;;  %1151 = vperm.xlu2 %1977, %v1995_v38  }
 0x1b1   : > { %v613_v3 = vadd.f32 %v592_v22, %v553_v41  ;;  %1980 = vset.pattern.permute.xlu1 %v2228_v42 }
 0x1b2   : > { %1183 = vperm.xlu1 %1980, %v1995_v38  }
 0x1b3   : > { %v635_v43 = vsel %vm493_vm0, %v613_v3, 0.0 }
 0x1b4   : > { %v637_v45 = vadd.f32 %v636_v34, %v635_v43 }
 0x1b6   : > { %1982 = vset.pattern.permute.xlu0 %v2229_v50  ;;  %v638_v30 = vrot.slane %v637_v45, 4 }
 0x1b7   : > { %1215 = vperm.xlu0 %1982, %v1995_v38  }
 0x1b8   : > { %1143 = vperm.xlu2 %1977, %v1996_v46   ;;  %v607_v57 = vpop.permute.xlu1 %606  ;;  %v639_v1 = vadd.f32 %v638_v30, %v637_v45 }
 0x1b9   : > { %v2688_v63 = vadd.f32 %v607_v57, %v556_v60 }
 0x1ba   : > { %1175 = vperm.xlu1 %1980, %v1996_v46   ;;  %v640_v5 = vrot.slane %v639_v1, 2 }
 0x1bb   : > { %v645_v13 = vsel %vm493_vm0, %v2688_v63, 0.0 }
 0x1bc   : > { %v641_v35 = vadd.f32 %v640_v5, %v639_v1 }
 0x1bf   : > { %1986 = vset.pattern.permute.xlu0 %v2230_v51 }
 0x1c0   : > { %1981 = vset.pattern.permute.xlu2 %v2228_v42  ;;  %1251 = vperm.xlu0 %1986, %v1993_v6  }
 0x1c1   : > { %1187 = vperm.xlu2 %1981, %v1993_v6  }
 0x1c2   : > { %1983 = vset.pattern.permute.xlu1 %v2229_v50 }
 0x1c3   : > { %1219 = vperm.xlu1 %1983, %v1993_v6   ;;  %v549_v6 = vmul.f32 %v535_v32, %v2494_v28 }
 0x1c5   : > { %v2698_v41 = vadd.f32 %v572_v55, %v549_v6 }
 0x1c7   : > { %v617_v43 = vsel %vm493_vm0, %v2698_v41, 0.0 }
 0x1c8   : > { %1988 = vset.pattern.permute.xlu0 %v2216_v0  ;;  %v555_v0 = vmul.f32 %v2649_v12, %v2477_v17  ;;  %v550_v12 = vmul.f32 %v535_v32, %v2501_v37  ;;  %v551_v32 = vmul.f32 %v2659_v18, %v2507_v47 }
 0x1c9   : > { %1179 = vperm.xlu2 %1981, %v1994_v36  }
 0x1ca   : > { %v2690_v8 = vadd.f32 %v602_v61, %v555_v0  ;;  %v2709_v0 = vpop.f32.mrf.mxu2 }
 0x1cb   : > { %1211 = vperm.xlu1 %1983, %v1994_v36  }
 0x1cc   : > { %v644_v21 = vsel %vm493_vm0, %v2690_v8, 0.0 }
 0x1cd   : > { %v646_v26 = vadd.f32 %v645_v13, %v644_v21 }
 0x1d1   : > { %1984 = vset.pattern.permute.xlu2 %v2229_v50  ;;  %v489_v50 = vmul.f32 %v479_v9, %v2482_v20 }
 0x1d2   : > { %1207 = vperm.xlu2 %1984, %v1996_v46  }
 0x1d3   : > { %1987 = vset.pattern.permute.xlu1 %v2230_v51 }
 0x1d4   : > { %1239 = vperm.xlu1 %1987, %v1996_v46  }
 0x1da   : > { %1985 = vset.pattern.permute.xlu2 %v2230_v51  ;;  %v490_v51 = vmul.f32 %v479_v9, %v2472_v15  ;;  %v552_v15 = vmul.f32 %v2659_v18, %v2517_v54 }
 0x1db   : > { %1247 = vperm.xlu2 %1985, %v1995_v38   ;;  %v647_v38 = vrot.slane %v646_v26, 4 }
 0x1dd   : > { %v648_v34 = vadd.f32 %v647_v38, %v646_v26 }
 0x1df   : > { %v649_v55 = vrot.slane %v648_v34, 2 }
 0x1e1   : > { %v650_v5 = vadd.f32 %v649_v55, %v648_v34  ;;  %v2731_v55 = vpop.f32.mrf.mxu2 }
 0x1e3   : > { %1243 = vperm.xlu2 %1985, %v1994_v36  }
 0x1e6   : > { %v582_v58 = vpop.permute.xlu2 %581 }
 0x1e7   : > { %v611_v57 = vadd.f32 %v582_v58, %v551_v32 }
 0x1ee   : > { %v577_v10 = vpop.permute.xlu1 %576 }
 0x1ef   : > { %v667_v11 = vpop.permute.xlu2 %666  ;;  %v610_v36 = vadd.f32 %v577_v10, %v550_v12  ;;  %v2714_v12 = vpop.f32.mrf.mxu1 }
 0x1f0   : > { %v677_v16 = vmul.f32 %v667_v11, %v613_v3  ;;  %v678_v7 = vmul.f32 %v667_v11, %v614_v27  ;;  %v642_v27 = vrot.slane %v641_v35, 1  ;;  %v487_v11 = vmul.f32 %v2491_v25, %v2507_v47 }
 0x1f1   : > { %v618_v3 = vsel %vm493_vm0, %v610_v36, 0.0  ;;  %v488_v47 = vmul.f32 %v2491_v25, %v2517_v54 }
 0x1f2   : > { %v619_v45 = vadd.f32 %v618_v3, %v617_v43  ;;  %v643_v46 = vadd.f32 %v642_v27, %v641_v35  ;;  %v685_v21 = vadd.f32 %v677_v16, %v489_v50  ;;  %v686_v6 = vadd.f32 %v678_v7, %v490_v51 }
 0x1f3   : > { %v651_v27 = vrot.slane %v650_v5, 1  ;;  %v626_v16 = vsel %vm493_vm0, %v611_v57, 0.0 }
 0x1f4   : > { %v620_v60 = vrot.slane %v619_v45, 4  ;;  %v655_v61 = vmul.f32 %v643_v46, %v2568_v14 }
 0x1f6   : > { %v621_v9 = vadd.f32 %v620_v60, %v619_v45  ;;  %v486_v45 = vmul.f32 %v2682_v52, %v2501_v37  ;;  %v652_v60 = vadd.f32 %v651_v27, %v650_v5 }
 0x1f7   : > { %v483_v22 = vpop.permute.xlu1 %482 }
 0x1f8   : > { %v2700_v42 = vpop.permute.xlu2 %705  ;;  %v622_v7 = vrot.slane %v621_v9, 2  ;;  %v492_v37 = vmul.f32 %v483_v22, %v2487_v23  ;;  %v2743_v23 = vpop.f32.mrf.mxu2 }
 0x1fa   : > { %v623_v54 = vadd.f32 %v622_v7, %v621_v9 }
 0x200   : > { %v701_v30 = vpop.permute.xlu1 %700 }
 0x201   : > { %v703_v1 = vperm.slane %v701_v30, 0  ;;  %v663_v10 = vpop.permute.xlu2 %662 }
 0x202   : > { %v675_v13 = vmul.f32 %v663_v10, %v611_v57 }
 0x203   : > { %v711_v20 = vmul.f32 %v703_v1, %v655_v61  ;;  %v2733_v61 = vpop.f32.mrf.mxu1  ;;  %v491_v1 = vmul.f32 %v483_v22, %v2477_v17 }
 0x204   : > { %v683_v58 = vadd.f32 %v675_v13, %v487_v11 }
 0x205   : > { %v2718_v26 = vadd.f32 %v711_v20, %v685_v21  ;;  %v2720_v35 = vadd.f32 %v711_v20, %v686_v6  ;;  %v587_v38 = vpop.permute.xlu0 %586  ;;  %v656_v6 = vmul.f32 %v652_v60, %v2568_v14  ;;  %v624_v20 = vrot.slane %v623_v54, 1 }
 0x206   : > { %v612_v3 = vadd.f32 %v587_v38, %v552_v15 }
 0x208   : > { %v627_v34 = vsel %vm493_vm0, %v612_v3, 0.0  ;;  %v676_v43 = vmul.f32 %v663_v10, %v612_v3  ;;  %v708_v10 = vperm.slane %v2700_v42, 0  ;;  %v625_v42 = vadd.f32 %v624_v20, %v623_v54 }
 0x209   : > { %v628_v46 = vadd.f32 %v627_v34, %v626_v16  ;;  %v2726_v18 = vpop.permute.xlu1 %658 }
 0x20a   : > { %v684_v32 = vadd.f32 %v676_v43, %v488_v47  ;;  %v674_v50 = vmul.f32 %v2726_v18, %v610_v36  ;;  %v1152_v51 = vpop.permute.xlu2 %1151  ;;  %v712_v38 = vmul.f32 %v708_v10, %v656_v6  ;;  %v653_v43 = vmul.f32 %v625_v42, %v2568_v14  ;;  %v2752_v10 = vpop.f32.mrf.mxu2 }
 0x20b   : > { %v629_v25 = vrot.slane %v628_v46, 4  ;;  %v1027_v7 = vpop.f32.mrf.mxu1 }
 0x20c   : > { %v682_v57 = vadd.f32 %v674_v50, %v486_v45 }
 0x20d   : > { %v630_v30 = vadd.f32 %v629_v25, %v628_v46 }
 0x20e   : > { %v671_v11 = vpop.permute.xlu0 %670 }
 0x20f   : > { %v631_v13 = vrot.slane %v630_v30, 2  ;;  %v679_v36 = vmul.f32 %v671_v11, %v2690_v8  ;;  %v680_v21 = vmul.f32 %v671_v11, %v2688_v63  ;;  %v1007_v11 = vpop.f32.mrf.mxu3 }
 0x211   : > { %v632_v5 = vadd.f32 %v631_v13, %v630_v30  ;;  %v687_v15 = vadd.f32 %v679_v36, %v491_v1  ;;  %v688_v9 = vadd.f32 %v680_v21, %v492_v37 }
 0x212   : > { %v696_v3 = vpop.permute.xlu1 %695  ;;  %v2741_v47 = vpop.permute.xlu2 %1143 }
 0x213   : > { %v633_v17 = vrot.slane %v632_v5, 1  ;;  %v719_v27 = vadd.f32 %v712_v38, %v687_v15  ;;  %v720_v16 = vadd.f32 %v712_v38, %v688_v9  ;;  %v698_v63 = vperm.slane %v696_v3, 0  ;;  %v1029_v13 = vpop.f32.mrf.mxu1  ;;  %v1125_v6 = vpop.f32.mrf.mxu2 }
 0x214   : > { %v1163_v38 = vmul.f32 %v1152_v51, %v2538_v31  ;;  %v673_v31 = vmul.f32 %v2726_v18, %v2698_v41 }
 0x215   : > { %v634_v22 = vadd.f32 %v633_v17, %v632_v5 }
 0x217   : > { %v654_v8 = vmul.f32 %v634_v22, %v2568_v14  ;;  %v691_v34 = vpop.permute.xlu0 %690  ;;  %v1009_v14 = vpop.f32.mrf.mxu3 }
 0x218   : > { %v693_v46 = vperm.slane %v691_v34, 0 }
 0x219   : > { %v710_v45 = vmul.f32 %v698_v63, %v654_v8 }
 0x21a   : > { %v2747_v50 = vmul.f32 %v693_v46, %v653_v43 }
 0x21b   : > { %v715_v25 = vadd.f32 %v710_v45, %v683_v58  ;;  %v716_v60 = vadd.f32 %v710_v45, %v684_v32  ;;  %v1156_v30 = vpop.permute.xlu1 %1155  ;;  %v1188_v54 = vpop.permute.xlu2 %1187 }
 0x21c   : > { %v2750_v1 = vadd.f32 %v2747_v50, %v682_v57  ;;  %v1105_v20 = vpop.f32.mrf.mxu1  ;;  %v1164_v15 = vmul.f32 %v1156_v30, %v2548_v44  ;;  %v1165_v58 = vmul.f32 %v1156_v30, %v2554_v53  ;;  %v1162_v57 = vmul.f32 %v1152_v51, %v2536_v24  ;;  %v1127_v45 = vpop.f32.mrf.mxu2 }
 0x21d   : > { %v1196_v8 = vmul.f32 %v1188_v54, %v1027_v7  ;;  %v1197_v63 = vmul.f32 %v1188_v54, %v1029_v13  ;;  %v1171_v44 = vadd.f32 %v1163_v38, %v2720_v35  ;;  %v485_v24 = vmul.f32 %v2682_v52, %v2494_v28 }
 0x21e   : > { %v1172_v42 = vadd.f32 %v1164_v15, %v719_v27  ;;  %v1173_v22 = vadd.f32 %v1165_v58, %v720_v16  ;;  %v1170_v34 = vadd.f32 %v1162_v57, %v2718_v26 }
 0x21f   : > { %v1085_v46 = vpop.f32.mrf.mxu3 }
 0x220   : > { %v1148_v37 = vpop.permute.xlu0 %1147  ;;  %v1204_v7 = vadd.f32 %v1196_v8, %v1172_v42  ;;  %v1205_v26 = vadd.f32 %v1197_v63, %v1173_v22 }
 0x221   : > { %v1160_v35 = vmul.f32 %v1148_v37, %v2524_v62 }
 0x223   : > { %v1180_v36 = vpop.permute.xlu2 %1179  ;;  %v1168_v62 = vadd.f32 %v1160_v35, %v715_v25 }
 0x224   : > { %v1184_v21 = vpop.permute.xlu1 %1183  ;;  %v1107_v16 = vpop.f32.mrf.mxu1 }
 0x225   : > { %v1194_v3 = vmul.f32 %v1184_v21, %v1007_v11  ;;  %v1195_v17 = vmul.f32 %v1184_v21, %v1009_v14 }
 0x227   : > { %v1202_v51 = vadd.f32 %v1194_v3, %v1170_v34  ;;  %v1203_v27 = vadd.f32 %v1195_v17, %v1171_v44  ;;  %v1087_v25 = vpop.f32.mrf.mxu3 }
 0x229   : > { %v1216_v5 = vpop.permute.xlu0 %1215 }
 0x22a   : > { %v1226_v53 = vmul.f32 %v1216_v5, %v2612_v19  ;;  %v1227_v43 = vmul.f32 %v1216_v5, %v2617_v29  ;;  %v1161_v19 = vmul.f32 %v1148_v37, %v2526_v4  ;;  %v681_v5 = vadd.f32 %v673_v31, %v485_v24 }
 0x22b   : > { %v1192_v4 = vmul.f32 %v1180_v36, %v2709_v0  ;;  %v1193_v37 = vmul.f32 %v1180_v36, %v2731_v55 }
 0x22c   : > { %v2756_v32 = vpop.permute.xlu1 %1175  ;;  %v2758_v9 = vpop.permute.xlu2 %1207  ;;  %v1234_v54 = vadd.f32 %v1226_v53, %v1202_v51  ;;  %v1235_v29 = vadd.f32 %v1227_v43, %v1203_v27  ;;  %v1169_v3 = vadd.f32 %v1161_v19, %v716_v60  ;;  %v2231_v19 = vmov 1983009808  }
 0x22d   : > { %v1200_v60 = vadd.f32 %v1192_v4, %v1168_v62 }
 0x22e   : > { %v1201_v34 = vadd.f32 %v1193_v37, %v1169_v3 }
 0x232   : > { %v1252_v30 = vpop.permute.xlu0 %1251 }
 0x233   : > { %v1260_v21 = vmul.f32 %v1252_v30, %v1125_v6  ;;  %v1261_v14 = vmul.f32 %v1252_v30, %v1127_v45 }
 0x235   : > { %v1220_v11 = vpop.permute.xlu1 %1219  ;;  %v1248_v13 = vpop.permute.xlu2 %1247 }
 0x236   : > { %v1228_v28 = vmul.f32 %v1220_v11, %v2629_v59  ;;  %v1229_v52 = vmul.f32 %v1220_v11, %v2623_v40  ;;  %v1258_v41 = vmul.f32 %v1248_v13, %v1105_v20  ;;  %v1259_v18 = vmul.f32 %v1248_v13, %v1107_v16 }
 0x237   : > { %v1158_v40 = vmul.f32 %v2741_v47, %v2509_v48  ;;  %v1159_v59 = vmul.f32 %v2741_v47, %v2511_v49  ;;  %v713_v20 = vadd.f32 %v2747_v50, %v681_v5  ;;  %v1190_v48 = vmul.f32 %v2756_v32, %v2714_v12 }
 0x238   : > { %v1236_v15 = vadd.f32 %v1228_v28, %v1204_v7  ;;  %v1237_v58 = vadd.f32 %v1229_v52, %v1205_v26  ;;  %v1266_v57 = vadd.f32 %v1258_v41, %v1234_v54  ;;  %v1267_v38 = vadd.f32 %v1259_v18, %v1235_v29 }
 0x239   : > { %v1191_v49 = vmul.f32 %v2756_v32, %v2733_v61  ;;  %v1166_v16 = vadd.f32 %v1158_v40, %v713_v20  ;;  %v1167_v7 = vadd.f32 %v1159_v59, %v2750_v1  ;;  %v1304_v54 = vunpack.c.l.s4 %v2231_v19 }
 0x23a   : > { %v1274_v17 = vpack.c.bf16 %v1266_v57, %v1266_v57  ;;  %v1275_v6 = vpack.c.bf16 %v1267_v38, %v1267_v38  ;;  %v1268_v42 = vadd.f32 %v1260_v21, %v1236_v15  ;;  %v1269_v22 = vadd.f32 %v1261_v14, %v1237_v58 }
 0x23b   : > { %v1198_v29 = vadd.f32 %v1190_v48, %v1166_v16  ;;  %v1199_v12 = vadd.f32 %v1191_v49, %v1167_v7  ;;  %v1305_v61 = vunpack.c.0.s8 %v1304_v54  ;;  %v2232_v5 = vmov 1934713408  }
 0x23c   : > { %v1276_v8 = vpack.c.bf16 %v1268_v42, %v1268_v42  ;;  %v1277_v63 = vpack.c.bf16 %v1269_v22, %v1269_v22  ;;  %v1287_v0 = vshrl.u32 %v1274_v17, 16  ;;  %v1299_v44 = vshrl.u32 %v1275_v6, 16 }
 0x23d   : > { %v1212_v55 = vpop.permute.xlu1 %1211  ;;  %v1244_v36 = vpop.permute.xlu2 %1243  ;;  %v1318_v15 = vunpack.c.l.s4 %v2232_v5 }
 0x23e   : > { %v1286_v53 = vpack.i.b16 %v1276_v8, %v1274_v17  ;;  %v1288_v43 = vshrl.u32 %v1276_v8, 16  ;;  %v1298_v45 = vpack.i.b16 %v1277_v63, %v1275_v6  ;;  %v1300_v30 = vshrl.u32 %v1277_v63, 16 }
 0x23f   : > { %v1224_v47 = vmul.f32 %v1212_v55, %v2597_v56  ;;  %v1225_v50 = vmul.f32 %v1212_v55, %v2605_v2  ;;  %v1256_v51 = vmul.f32 %v1244_v36, %v1085_v46  ;;  %v1257_v27 = vmul.f32 %v1244_v36, %v1087_v25 }
 0x240   : > { %v1289_v24 = vpack.i.b16 %v1288_v43, %v1287_v0  ;;  %v1301_v31 = vpack.i.b16 %v1300_v30, %v1299_v44  ;;  %v1222_v56 = vmul.f32 %v2758_v9, %v2576_v33  ;;  %v1223_v2 = vmul.f32 %v2758_v9, %v2583_v39 }
 0x241   : > { %v1232_v26 = vadd.f32 %v1224_v47, %v1200_v60  ;;  %v1233_v35 = vadd.f32 %v1225_v50, %v1201_v34  ;;  %v1311_v58 = vperm.slane %v1286_v53, %v1305_v61  ;;  %v1364_v62 = vperm.slane %v1298_v45, %v1305_v61 }
 0x242   : > { %v1230_v46 = vadd.f32 %v1222_v56, %v1198_v29  ;;  %v1231_v21 = vadd.f32 %v1223_v2, %v1199_v12  ;;  %v1338_v38 = vperm.slane %v1289_v24, %v1305_v61 }
 0x243   : > { %v1264_v11 = vadd.f32 %v1256_v51, %v1232_v26  ;;  %v1265_v13 = vadd.f32 %v1257_v27, %v1233_v35  ;;  %v1312_v59 = vrot.slane %v1311_v58, 4  ;;  %v1365_v20 = vrot.slane %v1364_v62, 4 }
 0x244   : > { %v1339_v8 = vrot.slane %v1338_v38, 4 }
 0x245   : > { %v1272_v28 = vpack.c.bf16 %v1264_v11, %v1264_v11  ;;  %v1273_v52 = vpack.c.bf16 %v1265_v13, %v1265_v13 }
 0x246   : > { %v1240_v32 = vpop.permute.xlu1 %1239 }
 0x247   : > { %v1254_v1 = vmul.f32 %v1240_v32, %v2743_v23  ;;  %v1255_v14 = vmul.f32 %v1240_v32, %v2752_v10  ;;  %v1282_v39 = vshrl.u32 %v1272_v28, 16  ;;  %v1294_v9 = vshrl.u32 %v1273_v52, 16 }
 0x248   : > { %v1390_v23 = vperm.slane %v1301_v31, %v1305_v61  ;;  %v2794_v10 = vunpack.c.0.s8 %v1318_v15 }
 0x249   : > { %v1262_v41 = vadd.f32 %v1254_v1, %v1230_v46  ;;  %v1263_v18 = vadd.f32 %v1255_v14, %v1231_v21 }
 0x24a   : > { %v1391_v0 = vrot.slane %v1390_v23, 4 }
 0x24b   : > { %v1270_v57 = vpack.c.bf16 %v1262_v41, %v1262_v41  ;;  %v1271_v33 = vpack.c.bf16 %v1263_v18, %v1263_v18 }
 0x24d   : > { %v1280_v3 = vpack.i.b16 %v1272_v28, %v1270_v57  ;;  %v1281_v4 = vshrl.u32 %v1270_v57, 16  ;;  %v1292_v37 = vpack.i.b16 %v1273_v52, %v1271_v33  ;;  %v1293_v17 = vshrl.u32 %v1271_v33, 16 }
 0x24f   : > { %v1283_v6 = vpack.i.b16 %v1282_v39, %v1281_v4  ;;  %v1295_v42 = vpack.i.b16 %v1294_v9, %v1293_v17  ;;  %v1306_v22 = vperm.slane %v1280_v3, %v1305_v61  ;;  %v1359_v40 = vperm.slane %v1292_v37, %v1305_v61 }
 0x251   : > { %v1315_v63 = vrot.slane %v1306_v22, 4  ;;  %v1333_v25 = vperm.slane %v1283_v6, %v1305_v61  ;;  %v1367_v60 = vrot.slane %v1359_v40, 4  ;;  %v1385_v34 = vperm.slane %v1295_v42, %v1305_v61 }
 0x252   : > { %v1314_v44 = vsel %vm1313_vm2, %v1312_v59, %v1306_v22  ;;  %v1366_v55 = vsel %vm1313_vm2, %v1365_v20, %v1359_v40 }
 0x253   : > { %v1316_v36 = vsel %vm1313_vm2, %v1311_v58, %v1315_v63  ;;  %v1341_v53 = vrot.slane %v1333_v25, 4  ;;  %v1340_v43 = vsel %vm1313_vm2, %v1339_v8, %v1333_v25  ;;  %v2801_v45 = vperm.slane %v1314_v44, %v2794_v10 }
 0x254   : > { %v1324_v30 = vperm.slane %v1316_v36, %v2794_v10  ;;  %v1346_v48 = vperm.slane %v1340_v43, %v2794_v10  ;;  %v1368_v49 = vsel %vm1313_vm2, %v1364_v62, %v1367_v60  ;;  %v1392_v50 = vsel %vm1313_vm2, %v1391_v0, %v1385_v34  ;;  %v1553_v36 = vld [vmem:[%s2907_s6] sm:$0xf] }
 0x255   : > { %v1342_v47 = vsel %vm1313_vm2, %v1338_v38, %v1341_v53  ;;  %v1325_v27 = vrot.slane %v2801_v45, 4  ;;  %v2816_v56 = vperm.slane %v1366_v55, %v2794_v10  ;;  %v1393_v2 = vrot.slane %v1385_v34, 4 }
 0x256   : > { %v1423_v24 = vunpack.c.l.b16 %v1324_v30  ;;  %v1350_v31 = vperm.slane %v1342_v47, %v2794_v10  ;;  %v1327_v51 = vrot.slane %v1324_v30, 4  ;;  %v1351_v35 = vrot.slane %v1346_v48, 4 }
 0x257   : > { %v1326_v12 = vsel %vm1313_vm2, 0, %v1325_v27  ;;  %v1408_v11 = vunpack.c.l.b16 %v1346_v48  ;;  %v1394_v46 = vsel %vm1313_vm2, %v1390_v23, %v1393_v2  ;;  %v1377_v14 = vrot.slane %v2816_v56, 4 }
 0x258   : > { %v1424_v16 = vpack.c.b16 %v1423_v24, %v1423_v24  ;;  %v1428_v7 = vunpack.c.l.b16 %v1350_v31  ;;  %v1328_v26 = vsel %vm1313_vm2, 0, %v1327_v51  ;;  %v1352_v13 = vsel %vm1313_vm2, 0, %v1351_v35 }
 0x259   : > { %v1433_v19 = vunpack.c.l.b16 %v1328_v26  ;;  %v1353_v61 = vrot.slane %v1350_v31, 4  ;;  %v1413_v32 = vunpack.c.l.b16 %v1326_v12  ;;  %v1418_v21 = vunpack.c.l.b16 %v1352_v13 }
 0x25a   : > { %1425 = vrot.lane.b32.xlu1 %v1424_v16, %s2233_s13  ;;  %v1429_v54 = vpack.c.b16 %v1428_v7, %v1428_v7  ;;  %v1409_v1 = vpack.c.b16 %v1408_v11, %v1408_v11  ;;  %v1398_v52 = vperm.slane %v1392_v50, %v2794_v10  ;;  %v1376_v18 = vperm.slane %v1368_v49, %v2794_v10  ;;  %v1513_v7 = vld [vmem:[%s2906_s5] sm:$0x3] }
 0x25b   : > { %v1434_v29 = vpack.c.b16 %v1433_v19, %v1433_v19  ;;  %v1354_v28 = vsel %vm1313_vm2, 0, %v1353_v61  ;;  %v1414_v41 = vpack.c.b16 %v1413_v32, %v1413_v32  ;;  %v1419_v5 = vpack.c.b16 %v1418_v21, %v1418_v21 }
 0x25c   : > { %1430 = vrot.lane.b32.xlu2 %v1429_v54, %s2234_s17  ;;  %v1438_v15 = vunpack.c.l.b16 %v1354_v28  ;;  %v1378_v58 = vsel %vm1313_vm2, 0, %v1377_v14  ;;  %v1403_v57 = vrot.slane %v1398_v52, 4  ;;  %v1458_v33 = vunpack.c.l.b16 %v1376_v18 }
 0x25d   : > { %1435 = vrot.lane.b32.xlu0 %v1434_v29, %s2235_s20  ;;  %v1448_v38 = vunpack.c.l.b16 %v1378_v58  ;;  %v1402_v4 = vperm.slane %v1394_v46, %v2794_v10  ;;  %v1379_v17 = vrot.slane %v1376_v18, 4  ;;  %v1443_v23 = vunpack.c.l.b16 %v1398_v52 }
 0x25e   : > { %v1439_v62 = vpack.c.b16 %v1438_v15, %v1438_v15  ;;  %v1404_v39 = vsel %vm1313_vm2, 0, %v1403_v57  ;;  %v1459_v9 = vpack.c.b16 %v1458_v33, %v1458_v33 }
 0x25f   : > { %v1449_v3 = vpack.c.b16 %v1448_v38, %v1448_v38  ;;  %v1453_v37 = vunpack.c.l.b16 %v1404_v39  ;;  %v1463_v6 = vunpack.c.l.b16 %v1402_v4  ;;  %v1405_v42 = vrot.slane %v1402_v4, 4 }
 0x260   : > { %v1380_v40 = vsel %vm1313_vm2, 0, %v1379_v17  ;;  %v1444_v59 = vpack.c.b16 %v1443_v23, %v1443_v23 }
 0x261   : > { %v1454_v22 = vpack.c.b16 %v1453_v37, %v1453_v37  ;;  %v1464_v20 = vpack.c.b16 %v1463_v6, %v1463_v6  ;;  %v1406_v8 = vsel %vm1313_vm2, 0, %v1405_v42  ;;  %v1468_v63 = vunpack.c.l.b16 %v1380_v40 }
 0x262   : > { %1410 = vrot.lane.b32.xlu1 %v1409_v1, %s2236_s21  ;;  %v1473_v10 = vunpack.c.l.b16 %v1406_v8  ;;  %v2239_v1 = vmov 839922192  }
 0x263   : > { %v1469_v25 = vpack.c.b16 %v1468_v63, %v1468_v63  ;;  %v1559_v14 = vunpack.c.l.s4 %v2239_v1 }
 0x264   : > { %1415 = vrot.lane.b32.xlu2 %v1414_v41, %s2237_s10  ;;  %v1474_v60 = vpack.c.b16 %v1473_v10, %v1473_v10 }
 0x265   : > { %1420 = vrot.lane.b32.xlu0 %v1419_v5, %s2238_s30  ;;  %v1560_v28 = vunpack.c.0.s8 %v1559_v14 }
 0x26a   : > { %1440 = vrot.lane.b32.xlu1 %v1439_v62, %s2221_s2 }
 0x26c   : > { %1460 = vrot.lane.b32.xlu2 %v1459_v9, %s2233_s13  ;;  %s1591_s13 = sshll.u32 %s1587_s16, 4  ;;  %s1592_s13 = int_to_ptr.hbm [resolvable:$true] %s1591_s13 }
 0x26d   : > { %1450 = vrot.lane.b32.xlu0 %v1449_v3, %s2237_s10 }
 0x272   : > { %1455 = vrot.lane.b32.xlu1 %v1454_v22, %s2238_s30  ;;  %s2139_s30 = scalar_lea.hbm %s2908_s7, 16 }
 0x274   : > { %1445 = vrot.lane.b32.xlu2 %v1444_v59, %s2236_s21 }
 0x275   : > { %1465 = vrot.lane.b32.xlu0 %v1464_v20, %s2234_s17  ;;  %s2133_s17 = sshra.s32 %s1592_s13, 4  ;;  %s2134_s17 = int_to_ptr.hbm [resolvable:$true] %s2133_s17 }
 0x276   : > { %p2140_p10 = scmp.lt.s32.totalorder %s2134_s17, %s2908_s7 }
 0x27a   : > { %1470 = vrot.lane.b32.xlu1 %v1469_v25, %s2235_s20  ;;  %s2135_s20 = scalar_lea.hbm %s2134_s17, 8 }
 0x27b   : > { %p2136_p1 = scmp.ne.s32.totalorder %s2134_s17, %s2135_s20  ;;  %p2141_p12 = scmp.lt.s32.totalorder %s2139_s30, %s2135_s20 }
 0x27c   : > { %1475 = vrot.lane.b32.xlu2 %v1474_v60, %s2221_s2 }
 0x27d   : > { %1556 = vperm.xlu0 %1988, %v1553_v36   ;;  %p2137_p4 = pnand %p2136_p1, %p2384_p5  ;;  %p2142_p13 = por %p2141_p12, %p2140_p10 }
 0x27f   : > { %p2138_p8 = pneg %p2137_p4 }
 0x281   : > { %p2143_p0 = pnand %p2142_p13, %p2138_p8 }
 0x2b6   : > { %v1431_v34 = vpop.permute.xlu2 %1430 }
 0x2be   : > { %v1416_v44 = vpop.permute.xlu2 %1415 }
 0x2c6   : > { %v1461_v48 = vpop.permute.xlu2 %1460 }
 0x2cc   : > { %v1426_v0 = vpop.permute.xlu1 %1425 }
 0x2ce   : > { %v1446_v26 = vpop.permute.xlu2 %1445 }
 0x2cf   : > { %v1436_v55 = vpop.permute.xlu0 %1435  ;;  %v1500_v35 = vsel %vm493_vm0, %v2816_v56, %v1446_v26 }
 0x2d4   : > { %v1411_v53 = vpop.permute.xlu1 %1410 }
 0x2d5   : > { %v1479_v43 = vsel %vm493_vm0, %v2801_v45, %v1411_v53 }
 0x2d6   : > { %v1482_v30 = vsel %vm1480_vm3, %v1479_v43, %v1416_v44  ;;  %v1476_v61 = vpop.permute.xlu2 %1475 }
 0x2d7   : > { %v1421_v49 = vpop.permute.xlu0 %1420 }
 0x2d8   : > { %v1485_v47 = vsel %vm1483_vm4, %v1482_v30, %v1421_v49 }
 0x2d9   : > { %v1488_v50 = vsel %vm1486_vm5, %v1485_v47, %v1426_v0 }
 0x2da   : > { %v1491_v24 = vsel %vm1489_vm6, %v1488_v50, %v1431_v34 }
 0x2db   : > { %v1494_v31 = vsel %vm1492_vm7, %v1491_v24, %v1436_v55 }
 0x2dc   : > { %v1441_v51 = vpop.permute.xlu1 %1440 }
 0x2dd   : > { %v1497_v45 = vsel %vm1495_vm8, %v1494_v31, %v1441_v51 }
 0x2de   : > { %v1519_v27 = vsel %vm1518_vm9, %v1497_v45, 0 }
 0x2df   : > { %v1451_v16 = vpop.permute.xlu0 %1450  ;;  %1530 = vmatpush.bf16.msra.mxu3 %v1519_v27 }
 0x2e0   : > { %v1502_v54 = vsel %vm1480_vm3, %v1500_v35, %v1451_v16 }
 0x2e2   : > { %1812 = vmatmul.msk.bf16.vlgmr.msra.gmra.mxu3 %vm1514_vm10, %v1513_v7 }
 0x2e4   : > { %v1456_v19 = vpop.permute.xlu1 %1455 }
 0x2e5   : > { %v1504_v29 = vsel %vm1483_vm4, %v1502_v54, %v1456_v19 }
 0x2e6   : > { %v1506_v11 = vsel %vm1486_vm5, %v1504_v29, %v1461_v48 }
 0x2e7   : > { %v1466_v12 = vpop.permute.xlu0 %1465 }
 0x2e8   : > { %v1508_v13 = vsel %vm1489_vm6, %v1506_v11, %v1466_v12 }
 0x2ec   : > { %v1471_v2 = vpop.permute.xlu1 %1470 }
 0x2ed   : > { %v1510_v32 = vsel %vm1492_vm7, %v1508_v13, %v1471_v2 }
 0x2ee   : > { %v1512_v46 = vsel %vm1495_vm8, %v1510_v32, %v1476_v61 }
 0x2ef   : > { %v1521_v56 = vsel %vm1518_vm9, %v1512_v46, 0  ;;  %v1557_v52 = vpop.permute.xlu0 %1556 }
 0x2f0   : > { %1543 = vmatpush.bf16.msrb.mxu1 %v1521_v56  ;;  %v1561_v18 = vperm.slane %v1557_v52, %v1560_v28 }
 0x2f3   : > { %1813 = vmatmul.msk.bf16.vlgmr.msrb.gmra.mxu1 %vm1514_vm10, %v1513_v7 }
 0x365   : > { %v1532_v21 = vpop.f32.mrf.mxu3 }
 0x36d   : > { %v1534_v41 = vpop.f32.mrf.mxu3 }
 0x370   : > { %v1545_v5 = vpop.f32.mrf.mxu1 }
 0x371   : > { %v1567_v15 = vrot.slane %v1545_v5, 4 }
 0x373   : > { %v1569_v58 = vsel %vm1568_vm11, %v1532_v21, %v1567_v15 }
 0x374   : > { %v1571_v57 = vadd.f32 %v1569_v58, %v1561_v18 }
 0x376   : > { %1572 = vst [vmem:[%s422_s15] sm:$0xff] %v1571_v57 }
 0x377   : > { %2146 = shalt.err (!%p2143_p0)
}
 0x378   : > { %1842 = dma.vmem_to_hbm [thread:$0]  (%p2384_p5), %s1590_s22, 128, %s1592_s13, %s1574_s27   ;;  %v1547_v33 = vpop.f32.mrf.mxu1 }
 0x379 PF: > { %s2932_s18 = sld [smem:[#allocation15_spill]]  ;;  %s1603_s2 = sand.u32 1, %s2189_s24  }
 0x37a   : > { %p1859_p3 = pnand %p1762_p11, %p2329_p6  ;;  %s1604_s3 = scalar_lea.sflag [#allocation4], %s1603_s2 }
 0x37c   : > { %p1860_p7 = pneg %p1859_p3 }
 0x37e   : > { %2184 = dma.done.wait (%p1860_p7), %s1604_s3, 128  }
 0x37f   : > { %2186 = vsyncadd (%p1860_p7), %s1604_s3, 4294967168  ;;  %s25_s29 = sadd.s32 1, %s2932_s18   ;;  %s2933_s19 = sld [smem:[#allocation16_spill]] }
 0x380   : > { %p22_p9 = scmp.ge.s32.totalorder %s25_s29, 4   ;;  %s2934_s24 = smov %s2193_s25 }
 0x381   : > { %s2935_s25 = smov %s2197_s26  ;;  %s2936_s26 = smov %s2393_s14 }
 0x382   : > { %s2937_s27 = smov %s2205_s28  ;;  %24 = sbr.rel (!%p22_p9) target bundleno = 12 (0xc), region = 118 }
 0x385   : > { %s2938_s28 = smov %s2933_s19 }
 0x387   :  { %1610 = vsyncpa [#allocation3], 1 }
 0x388   :  { %1612 = vsyncpa [#allocation3 + $0x1], 1 }
 0x389   :  { %1613 = vsyncpa [#allocation6], 1 }
 0x38a   :  { %1614 = vsyncpa [#allocation9], 1 }
 0x38b   :  { %1615 = vsyncpa [#allocation4], 1 }
 0x38c   :  { %1617 = vsyncpa [#allocation4 + $0x1], 1 }

</bundles_post_ra>
